<compile_context>
chip_gen: v6e
topology: v6e:2x2x1
jax: 0.10.0
libtpu: 0.0.40
codegen_flags: <defaults>
</compile_context>

<pallas_src>
import jax
import jax.numpy as jnp
from jax.experimental import pallas as pl
from jax.experimental.pallas import tpu as pltpu


def _make_kernel(th, wout, cin, tcs, merge_dx):
    """Kernel body; all tile parameters are static (closed over)."""

    def kernel(xb_ref, xh_ref, w_ref, shift_ref, o_ref):
        # Stitch the (th+2)-row halo window for this H tile: th-row body block
        # + 2-row halo block, concatenated along the (untiled) leading dim.
        x = jnp.concatenate([xb_ref[...], xh_ref[...]], axis=0)   # (th+2, W+2, Cin)

        acc = None
        if merge_dx:
            # Fold the 3 dx taps into the channel (lane) axis once -> K = 3*Cin,
            # 3 matmuls + 2 accumulator adds instead of 9 RMW passes.
            xm = jnp.concatenate([x[:, dx:dx + wout, :] for dx in range(3)],
                                 axis=-1)                          # (th+2, W, 3Cin)
            for dy in range(3):
                lhs = xm[dy:dy + th].reshape(th * wout, 3 * cin)
                p = jnp.dot(lhs, w_ref[dy], preferred_element_type=jnp.float32)
                acc = p if acc is None else acc + p
        else:
            # Small / unaligned Cin: plain per-tap accumulation (no lane concat).
            for dy in range(3):
                for dx in range(3):
                    lhs = x[dy:dy + th, dx:dx + wout, :].reshape(th * wout, cin)
                    p = jnp.dot(lhs, w_ref[dy * 3 + dx],
                                preferred_element_type=jnp.float32)
                    acc = p if acc is None else acc + p

        # Epilogue: folded BN shift + ReLU, on only the real Cout lanes.
        acc = acc[:, :tcs]
        shift = shift_ref[...][:, :tcs]
        y = jnp.maximum(acc + shift, 0.0).astype(o_ref.dtype)
        o_ref[...] = y.reshape(th, wout, tcs)

    return kernel


def _pick_h_tile(h, w, cin, tcm):
    """Largest even row tile (<= ~32) whose rough VMEM footprint fits ~20 MiB."""
    nh = max(1, pl.cdiv(h, 32))
    while True:
        th = pl.cdiv(h, nh)
        th += th % 2                        # even: needed by the 2-row halo index
        est = (2 * (th + 2) * (w + 2) * cin * 2     # x body+halo, double-buffered
               + 2 * th * w * tcm * 2               # bf16 out tile, double-buffered
               + 2 * 9 * cin * tcm * 2              # weights, double-buffered
               + 4 * (th + 2) * w * 3 * cin * 2     # in-kernel window + merged lhs
               + th * w * tcm * 4)                  # f32 accumulator
        if est <= 20 * 1024 * 1024 or th <= 8:
            return th, nh
        nh += 1


def conv_block(x_nchw, w_oihw, bias, gamma, beta, running_mean, running_var,
               eps=1e-5):
    """ConvBlock forward. Input/output in PyTorch NCHW convention."""
    N, Cin, H, W = x_nchw.shape
    Cout = w_oihw.shape[0]
    LANE = 128

    # ---- Cout tiling: pad the matmul N dim to a lane multiple, but keep the
    # stored output un-padded when Cout <= 256 (narrow masked store beats a
    # 16x-inflated HBM writeback for tiny Cout). ----
    cout_mat = pl.cdiv(Cout, LANE) * LANE
    if cout_mat <= 256:
        tcm, nc = cout_mat, 1
        tcs, cout_out = Cout, Cout                     # no channel slice needed
    else:
        tcm = 256 if cout_mat % 256 == 0 else LANE     # 256-wide tiles for v6e/v7x
        nc = cout_mat // tcm
        tcs, cout_out = tcm, cout_mat

    th, nh = _pick_h_tile(H, W, Cin, tcm)
    H_pad = nh * th                                     # rows >= H, extra sliced off

    merge_dx = (Cin % LANE == 0)                        # lane-aligned in-kernel merge

    # ---- wrapper-side prep (plain XLA): NHWC, bf16, pad, fold BN into w/shift ----
    x = jnp.transpose(x_nchw, (0, 2, 3, 1)).astype(jnp.bfloat16)       # NHWC
    x_pad = jnp.pad(x, ((0, 0), (1, 1 + H_pad - H), (1, 1), (0, 0)))   # (N,H_pad+2,W+2,Cin)

    scale = gamma / jnp.sqrt(running_var + eps)                        # BN (eval)
    shift = (bias - running_mean) * scale + beta                       # conv bias folded
    shift_p = jnp.pad(shift, (0, cout_mat - Cout)).reshape(1, cout_mat).astype(jnp.float32)

    w_t = jnp.transpose(w_oihw, (2, 3, 1, 0)) * scale                  # (3,3,Cin,Cout)*scale
    if merge_dx:
        w_k = w_t.reshape(3, 3 * Cin, Cout)            # [dy, dx*Cin + i, o]
        n_w, kdim = 3, 3 * Cin
    else:
        w_k = w_t.reshape(9, Cin, Cout)                # [dy*3 + dx, i, o]
        n_w, kdim = 9, Cin
    w_k = jnp.pad(w_k, ((0, 0), (0, 0), (0, cout_mat - Cout))).astype(jnp.bfloat16)

    kernel = _make_kernel(th, W, Cin, tcs, merge_dx)

    out = pl.pallas_call(
        kernel,
        out_shape=jax.ShapeDtypeStruct((N, H_pad, W, cout_out), jnp.bfloat16),
        grid=(N, nh, nc),
        in_specs=[
            # th-row body of the halo window (non-overlapping -> plain pipelining)
            pl.BlockSpec((None, th, W + 2, Cin), lambda n, h, c: (n, h, 0, 0)),
            # 2-row bottom halo of the same window (same array, 2-row blocks)
            pl.BlockSpec((None, 2, W + 2, Cin),
                         lambda n, h, c: (n, (h + 1) * (th // 2), 0, 0)),
            pl.BlockSpec((n_w, kdim, tcm), lambda n, h, c: (0, 0, c)),
            pl.BlockSpec((1, tcm), lambda n, h, c: (0, c)),
        ],
        out_specs=pl.BlockSpec((None, th, W, tcs), lambda n, h, c: (n, h, 0, c)),
        compiler_params=pltpu.CompilerParams(
            dimension_semantics=("parallel", "parallel", "parallel"),
            vmem_limit_bytes=48 * 1024 * 1024),
    )(x_pad, x_pad, w_k, shift_p)

    out = out[:, :H]                                   # drop padded rows (if any)
    if cout_out != Cout:
        out = out[..., :Cout]                          # drop padded channels
    # NCHW output contract of the PyTorch module (slice/transpose on bf16 data).
    return jnp.transpose(out, (0, 3, 1, 2)).astype(x_nchw.dtype)


conv_block = jax.jit(conv_block)


def reference(x_nchw, w_oihw, bias, gamma, beta, running_mean, running_var,
              eps=1e-5):
    """Pure-JAX reference (NCHW conv + eval-mode BN + ReLU)."""
    y = jax.lax.conv_general_dilated(
        x_nchw, w_oihw, window_strides=(1, 1), padding=((1, 1), (1, 1)),
        dimension_numbers=("NCHW", "OIHW", "NCHW"))
    y = y + bias[None, :, None, None]
    scale = gamma / jnp.sqrt(running_var + eps)
    shift = beta - running_mean * scale
    y = y * scale[None, :, None, None] + shift[None, :, None, None]
    return jnp.maximum(y, 0.0)


if __name__ == "__main__":
    key = jax.random.PRNGKey(0)
    k_x, k_w, k_b, k_g, k_be, k_m, k_v = jax.random.split(key, 7)

    N, Cin, H, W = 2, 4, 16, 16
    Cout = 8

    x = jax.random.normal(k_x, (N, Cin, H, W), jnp.float32)
    w = jax.random.normal(k_w, (Cout, Cin, 3, 3), jnp.float32) * 0.1
    b = jax.random.normal(k_b, (Cout,), jnp.float32) * 0.1
    gamma = jax.random.normal(k_g, (Cout,), jnp.float32) * 0.1 + 1.0
    beta = jax.random.normal(k_be, (Cout,), jnp.float32) * 0.1
    running_mean = jax.random.normal(k_m, (Cout,), jnp.float32) * 0.1
    running_var = jax.random.uniform(k_v, (Cout,), jnp.float32,
                                     minval=0.5, maxval=1.5)

    out = conv_block(x, w, b, gamma, beta, running_mean, running_var)
    out = jax.block_until_ready(out)

    ref = reference(x, w, b, gamma, beta, running_mean, running_var)
    assert out.shape == (N, Cout, H, W)
    assert jnp.allclose(out, ref, rtol=2e-2, atol=2e-2), "mismatch vs reference"

    print("KERNEL_OK")
</pallas_src>

<mosaic_0001>
module attributes {stable_mosaic.version = 11 : i64} {
  func.func @kernel(%arg0: i32, %arg1: i32, %arg2: i32, %arg3: memref<1x16x18x4xbf16, #tpu.memory_space<vmem>>, %arg4: memref<1x2x18x4xbf16, #tpu.memory_space<vmem>>, %arg5: memref<9x4x128xbf16, #tpu.memory_space<vmem>>, %arg6: memref<1x128xf32, #tpu.memory_space<vmem>>, %arg7: memref<1x16x16x8xbf16, #tpu.memory_space<vmem>>) attributes {dimension_semantics = [#tpu.dimension_semantics<parallel>, #tpu.dimension_semantics<parallel>, #tpu.dimension_semantics<parallel>], iteration_bounds = array<i64: 2, 1, 1>, scalar_prefetch = 0 : i64, scratch_operands = 0 : i64, tpu.core_type = #tpu.core_type<tc>, window_params = [{transform_indices = @transform_0, window_bounds = array<i64: 1, 16, 18, 4>}, {transform_indices = @transform_1, window_bounds = array<i64: 1, 2, 18, 4>}, {transform_indices = @transform_2, window_bounds = array<i64: 9, 4, 128>}, {transform_indices = @transform_3, window_bounds = array<i64: 1, 128>}, {transform_indices = @transform_4, window_bounds = array<i64: 1, 16, 16, 8>}]} {
    %c0 = arith.constant 0 : index
    %c0_0 = arith.constant 0 : index
    %c0_1 = arith.constant 0 : index
    %c0_2 = arith.constant 0 : index
    %0 = vector.load %arg3[%c0, %c0_0, %c0_1, %c0_2] : memref<1x16x18x4xbf16, #tpu.memory_space<vmem>>, vector<1x16x18x4xbf16>
    %1 = vector.shape_cast %0 : vector<1x16x18x4xbf16> to vector<16x18x4xbf16>
    %c0_3 = arith.constant 0 : index
    %c0_4 = arith.constant 0 : index
    %c0_5 = arith.constant 0 : index
    %c0_6 = arith.constant 0 : index
    %2 = vector.load %arg4[%c0_3, %c0_4, %c0_5, %c0_6] : memref<1x2x18x4xbf16, #tpu.memory_space<vmem>>, vector<1x2x18x4xbf16>
    %3 = vector.shape_cast %2 : vector<1x2x18x4xbf16> to vector<2x18x4xbf16>
    %4 = tpu.concatenate %1, %3 in 0 : vector<16x18x4xbf16>, vector<2x18x4xbf16> -> vector<18x18x4xbf16>
    %5 = vector.extract_strided_slice %4 {offsets = [0, 0, 0], sizes = [16, 16, 4], strides = [1, 1, 1]} : vector<18x18x4xbf16> to vector<16x16x4xbf16>
    %6 = vector.shape_cast %5 : vector<16x16x4xbf16> to vector<256x4xbf16>
    %c0_7 = arith.constant 0 : index
    %c0_8 = arith.constant 0 : index
    %c0_9 = arith.constant 0 : index
    %7 = vector.load %arg5[%c0_7, %c0_8, %c0_9] : memref<9x4x128xbf16, #tpu.memory_space<vmem>>, vector<1x4x128xbf16>
    %8 = vector.shape_cast %7 : vector<1x4x128xbf16> to vector<4x128xbf16>
    %cst = arith.constant dense<0.000000e+00> : vector<256x128xf32>
    %9 = tpu.matmul %6, %8, %cst {dimension_numbers = #tpu.dot_dimension_numbers<[1], [0], [0], [1], [0, 0, 1, 1], [], []>} : vector<256x4xbf16>, vector<4x128xbf16>, vector<256x128xf32> -> vector<256x128xf32>
    %10 = vector.extract_strided_slice %4 {offsets = [0, 1, 0], sizes = [16, 16, 4], strides = [1, 1, 1]} : vector<18x18x4xbf16> to vector<16x16x4xbf16>
    %11 = vector.shape_cast %10 : vector<16x16x4xbf16> to vector<256x4xbf16>
    %c1 = arith.constant 1 : index
    %c0_10 = arith.constant 0 : index
    %c0_11 = arith.constant 0 : index
    %12 = vector.load %arg5[%c1, %c0_10, %c0_11] : memref<9x4x128xbf16, #tpu.memory_space<vmem>>, vector<1x4x128xbf16>
    %13 = vector.shape_cast %12 : vector<1x4x128xbf16> to vector<4x128xbf16>
    %cst_12 = arith.constant dense<0.000000e+00> : vector<256x128xf32>
    %14 = tpu.matmul %11, %13, %cst_12 {dimension_numbers = #tpu.dot_dimension_numbers<[1], [0], [0], [1], [0, 0, 1, 1], [], []>} : vector<256x4xbf16>, vector<4x128xbf16>, vector<256x128xf32> -> vector<256x128xf32>
    %15 = arith.addf %9, %14 : vector<256x128xf32>
    %16 = vector.extract_strided_slice %4 {offsets = [0, 2, 0], sizes = [16, 16, 4], strides = [1, 1, 1]} : vector<18x18x4xbf16> to vector<16x16x4xbf16>
    %17 = vector.shape_cast %16 : vector<16x16x4xbf16> to vector<256x4xbf16>
    %c2 = arith.constant 2 : index
    %c0_13 = arith.constant 0 : index
    %c0_14 = arith.constant 0 : index
    %18 = vector.load %arg5[%c2, %c0_13, %c0_14] : memref<9x4x128xbf16, #tpu.memory_space<vmem>>, vector<1x4x128xbf16>
    %19 = vector.shape_cast %18 : vector<1x4x128xbf16> to vector<4x128xbf16>
    %cst_15 = arith.constant dense<0.000000e+00> : vector<256x128xf32>
    %20 = tpu.matmul %17, %19, %cst_15 {dimension_numbers = #tpu.dot_dimension_numbers<[1], [0], [0], [1], [0, 0, 1, 1], [], []>} : vector<256x4xbf16>, vector<4x128xbf16>, vector<256x128xf32> -> vector<256x128xf32>
    %21 = arith.addf %15, %20 : vector<256x128xf32>
    %22 = vector.extract_strided_slice %4 {offsets = [1, 0, 0], sizes = [16, 16, 4], strides = [1, 1, 1]} : vector<18x18x4xbf16> to vector<16x16x4xbf16>
    %23 = vector.shape_cast %22 : vector<16x16x4xbf16> to vector<256x4xbf16>
    %c3 = arith.constant 3 : index
    %c0_16 = arith.constant 0 : index
    %c0_17 = arith.constant 0 : index
    %24 = vector.load %arg5[%c3, %c0_16, %c0_17] : memref<9x4x128xbf16, #tpu.memory_space<vmem>>, vector<1x4x128xbf16>
    %25 = vector.shape_cast %24 : vector<1x4x128xbf16> to vector<4x128xbf16>
    %cst_18 = arith.constant dense<0.000000e+00> : vector<256x128xf32>
    %26 = tpu.matmul %23, %25, %cst_18 {dimension_numbers = #tpu.dot_dimension_numbers<[1], [0], [0], [1], [0, 0, 1, 1], [], []>} : vector<256x4xbf16>, vector<4x128xbf16>, vector<256x128xf32> -> vector<256x128xf32>
    %27 = arith.addf %21, %26 : vector<256x128xf32>
    %28 = vector.extract_strided_slice %4 {offsets = [1, 1, 0], sizes = [16, 16, 4], strides = [1, 1, 1]} : vector<18x18x4xbf16> to vector<16x16x4xbf16>
    %29 = vector.shape_cast %28 : vector<16x16x4xbf16> to vector<256x4xbf16>
    %c4 = arith.constant 4 : index
    %c0_19 = arith.constant 0 : index
    %c0_20 = arith.constant 0 : index
    %30 = vector.load %arg5[%c4, %c0_19, %c0_20] : memref<9x4x128xbf16, #tpu.memory_space<vmem>>, vector<1x4x128xbf16>
    %31 = vector.shape_cast %30 : vector<1x4x128xbf16> to vector<4x128xbf16>
    %cst_21 = arith.constant dense<0.000000e+00> : vector<256x128xf32>
    %32 = tpu.matmul %29, %31, %cst_21 {dimension_numbers = #tpu.dot_dimension_numbers<[1], [0], [0], [1], [0, 0, 1, 1], [], []>} : vector<256x4xbf16>, vector<4x128xbf16>, vector<256x128xf32> -> vector<256x128xf32>
    %33 = arith.addf %27, %32 : vector<256x128xf32>
    %34 = vector.extract_strided_slice %4 {offsets = [1, 2, 0], sizes = [16, 16, 4], strides = [1, 1, 1]} : vector<18x18x4xbf16> to vector<16x16x4xbf16>
    %35 = vector.shape_cast %34 : vector<16x16x4xbf16> to vector<256x4xbf16>
    %c5 = arith.constant 5 : index
    %c0_22 = arith.constant 0 : index
    %c0_23 = arith.constant 0 : index
    %36 = vector.load %arg5[%c5, %c0_22, %c0_23] : memref<9x4x128xbf16, #tpu.memory_space<vmem>>, vector<1x4x128xbf16>
    %37 = vector.shape_cast %36 : vector<1x4x128xbf16> to vector<4x128xbf16>
    %cst_24 = arith.constant dense<0.000000e+00> : vector<256x128xf32>
    %38 = tpu.matmul %35, %37, %cst_24 {dimension_numbers = #tpu.dot_dimension_numbers<[1], [0], [0], [1], [0, 0, 1, 1], [], []>} : vector<256x4xbf16>, vector<4x128xbf16>, vector<256x128xf32> -> vector<256x128xf32>
    %39 = arith.addf %33, %38 : vector<256x128xf32>
    %40 = vector.extract_strided_slice %4 {offsets = [2, 0, 0], sizes = [16, 16, 4], strides = [1, 1, 1]} : vector<18x18x4xbf16> to vector<16x16x4xbf16>
    %41 = vector.shape_cast %40 : vector<16x16x4xbf16> to vector<256x4xbf16>
    %c6 = arith.constant 6 : index
    %c0_25 = arith.constant 0 : index
    %c0_26 = arith.constant 0 : index
    %42 = vector.load %arg5[%c6, %c0_25, %c0_26] : memref<9x4x128xbf16, #tpu.memory_space<vmem>>, vector<1x4x128xbf16>
    %43 = vector.shape_cast %42 : vector<1x4x128xbf16> to vector<4x128xbf16>
    %cst_27 = arith.constant dense<0.000000e+00> : vector<256x128xf32>
    %44 = tpu.matmul %41, %43, %cst_27 {dimension_numbers = #tpu.dot_dimension_numbers<[1], [0], [0], [1], [0, 0, 1, 1], [], []>} : vector<256x4xbf16>, vector<4x128xbf16>, vector<256x128xf32> -> vector<256x128xf32>
    %45 = arith.addf %39, %44 : vector<256x128xf32>
    %46 = vector.extract_strided_slice %4 {offsets = [2, 1, 0], sizes = [16, 16, 4], strides = [1, 1, 1]} : vector<18x18x4xbf16> to vector<16x16x4xbf16>
    %47 = vector.shape_cast %46 : vector<16x16x4xbf16> to vector<256x4xbf16>
    %c7 = arith.constant 7 : index
    %c0_28 = arith.constant 0 : index
    %c0_29 = arith.constant 0 : index
    %48 = vector.load %arg5[%c7, %c0_28, %c0_29] : memref<9x4x128xbf16, #tpu.memory_space<vmem>>, vector<1x4x128xbf16>
    %49 = vector.shape_cast %48 : vector<1x4x128xbf16> to vector<4x128xbf16>
    %cst_30 = arith.constant dense<0.000000e+00> : vector<256x128xf32>
    %50 = tpu.matmul %47, %49, %cst_30 {dimension_numbers = #tpu.dot_dimension_numbers<[1], [0], [0], [1], [0, 0, 1, 1], [], []>} : vector<256x4xbf16>, vector<4x128xbf16>, vector<256x128xf32> -> vector<256x128xf32>
    %51 = arith.addf %45, %50 : vector<256x128xf32>
    %52 = vector.extract_strided_slice %4 {offsets = [2, 2, 0], sizes = [16, 16, 4], strides = [1, 1, 1]} : vector<18x18x4xbf16> to vector<16x16x4xbf16>
    %53 = vector.shape_cast %52 : vector<16x16x4xbf16> to vector<256x4xbf16>
    %c8 = arith.constant 8 : index
    %c0_31 = arith.constant 0 : index
    %c0_32 = arith.constant 0 : index
    %54 = vector.load %arg5[%c8, %c0_31, %c0_32] : memref<9x4x128xbf16, #tpu.memory_space<vmem>>, vector<1x4x128xbf16>
    %55 = vector.shape_cast %54 : vector<1x4x128xbf16> to vector<4x128xbf16>
    %cst_33 = arith.constant dense<0.000000e+00> : vector<256x128xf32>
    %56 = tpu.matmul %53, %55, %cst_33 {dimension_numbers = #tpu.dot_dimension_numbers<[1], [0], [0], [1], [0, 0, 1, 1], [], []>} : vector<256x4xbf16>, vector<4x128xbf16>, vector<256x128xf32> -> vector<256x128xf32>
    %57 = arith.addf %51, %56 : vector<256x128xf32>
    %58 = vector.extract_strided_slice %57 {offsets = [0, 0], sizes = [256, 8], strides = [1, 1]} : vector<256x128xf32> to vector<256x8xf32>
    %c0_34 = arith.constant 0 : index
    %c0_35 = arith.constant 0 : index
    %59 = vector.load %arg6[%c0_34, %c0_35] : memref<1x128xf32, #tpu.memory_space<vmem>>, vector<1x128xf32>
    %60 = vector.extract_strided_slice %59 {offsets = [0, 0], sizes = [1, 8], strides = [1, 1]} : vector<1x128xf32> to vector<1x8xf32>
    %61 = vector.broadcast %60 : vector<1x8xf32> to vector<256x8xf32>
    %62 = arith.addf %58, %61 : vector<256x8xf32>
    %cst_36 = arith.constant 0.000000e+00 : f32
    %63 = vector.broadcast %cst_36 : f32 to vector<256x8xf32>
    %64 = arith.maximumf %62, %63 : vector<256x8xf32>
    %65 = arith.truncf %64 : vector<256x8xf32> to vector<256x8xbf16>
    %66 = vector.shape_cast %65 : vector<256x8xbf16> to vector<16x16x8xbf16>
    %c0_37 = arith.constant 0 : index
    %c0_38 = arith.constant 0 : index
    %c0_39 = arith.constant 0 : index
    %c0_40 = arith.constant 0 : index
    %67 = vector.load %arg7[%c0_37, %c0_38, %c0_39, %c0_40] : memref<1x16x16x8xbf16, #tpu.memory_space<vmem>>, vector<1x16x16x8xbf16>
    %68 = vector.shape_cast %67 : vector<1x16x16x8xbf16> to vector<16x16x8xbf16>
    %69 = vector.shape_cast %66 : vector<16x16x8xbf16> to vector<1x16x16x8xbf16>
    tpu.vector_store %arg7[%c0_37, %c0_38, %c0_39, %c0_40], %69 {strides = array<i32>} : memref<1x16x16x8xbf16, #tpu.memory_space<vmem>>, vector<1x16x16x8xbf16>,
    return
  }
  func.func @transform_0(%arg0: i32, %arg1: i32, %arg2: i32) -> (i32, i32, i32, i32) {
    %c0_i32 = arith.constant 0 : i32
    %c0_i32_0 = arith.constant 0 : i32
    %c0_i32_1 = arith.constant 0 : i32
    return %arg0, %arg1, %c0_i32, %c0_i32_0 : i32, i32, i32, i32
  }
  func.func @transform_1(%arg0: i32, %arg1: i32, %arg2: i32) -> (i32, i32, i32, i32) {
    %c1_i32 = arith.constant 1 : i32
    %0 = arith.addi %arg1, %c1_i32 : i32
    %c8_i32 = arith.constant 8 : i32
    %1 = arith.muli %0, %c8_i32 : i32
    %c0_i32 = arith.constant 0 : i32
    %c0_i32_0 = arith.constant 0 : i32
    %c0_i32_1 = arith.constant 0 : i32
    return %arg0, %1, %c0_i32, %c0_i32_0 : i32, i32, i32, i32
  }
  func.func @transform_2(%arg0: i32, %arg1: i32, %arg2: i32) -> (i32, i32, i32) {
    %c0_i32 = arith.constant 0 : i32
    %c0_i32_0 = arith.constant 0 : i32
    %c0_i32_1 = arith.constant 0 : i32
    return %c0_i32, %c0_i32_0, %arg2 : i32, i32, i32
  }
  func.func @transform_3(%arg0: i32, %arg1: i32, %arg2: i32) -> (i32, i32) {
    %c0_i32 = arith.constant 0 : i32
    %c0_i32_0 = arith.constant 0 : i32
    return %c0_i32, %arg2 : i32, i32
  }
  func.func @transform_4(%arg0: i32, %arg1: i32, %arg2: i32) -> (i32, i32, i32, i32) {
    %c0_i32 = arith.constant 0 : i32
    %c0_i32_0 = arith.constant 0 : i32
    return %arg0, %arg1, %c0_i32, %arg2 : i32, i32, i32, i32
  }
}

</mosaic_0001>

<bundles_post_ra>
// kernel: conv_block.1
= control target key start
LH: loop header
LB: loop body
LE: loop exit
PB: predicated region body
PF: predicated region fallthrough
CT: control target
= control target key end

     0   :  { %s4341_s15 = smov 0   ;;  %s4343_s16 = smov 0   ;;  %s5906_s0 = inlined_call_operand.vmem [shape: bf16[2,18,18,4], index: 0, kind: input, shape index: {}, may-alias: {0,1}]   ;;  %s5907_s1 = inlined_call_operand.vmem [shape: bf16[2,18,18,4], index: 1, kind: input, shape index: {}, may-alias: {0,1}]   ;;  %s5908_s2 = inlined_call_operand.vmem [shape: bf16[9,4,128], index: 2, kind: input, shape index: {}]   ;;  %s5909_s3 = inlined_call_operand.vmem [shape: f32[1,128], index: 3, kind: input, shape index: {}]   ;;  %s5910_s4 = inlined_call_operand.vmem [shape: bf16[2,16,16,8], index: 4, kind: output, shape index: {}]  }
   0x1   :  { %s4345_s17 = smov 0  }
   0x2 LB: > { %s33_s18 = sadd.s32 1, %s4310_s16  ;;  %p3477_p0 = scmp.ge.s32.totalorder %s4314_s17, 1  ;;  %s4314_s17 = sphi %s4345_s17, %s14_s17   ;;  %s4310_s16 = sphi %s4343_s16, %s6116_s16   ;;  %s4306_s15 = sphi %s4341_s15, %s6115_s15  }
   0x3   : > { %p35_p1 = scmp.ge.s32.totalorder %s33_s18, 2  ;;  %p246_p2 = scmp.lt.s32.totalorder %s4314_s17, 3 }
   0x5   : > { %s6118_s18 = smov (%p35_p1, %s33_s18), 0  ;;  %p247_p3 = pnand %p3477_p0, %p246_p2 }
   0x7   : > { %250 = sbr.rel (%p247_p3) target bundleno = 559 (0x22f), region = 36 }
   0xc   : > { %v3482_v0 = vld [vmem:[%s5908_s2 + $0x2] sm:$0x3]  ;;  %vm908_vm0 = vcmask 1041408   ;;  %p315_p4 = scmp.lt.s32.totalorder %s4306_s15, 1  ;;  %v421_v2 = vld [vmem:[%s5908_s2] sm:$0x3] }
   0xd   : > { %4238 = vmatprep.subr.msk.bf16.mxu1 %vm908_vm0, %v3482_v0  ;;  %4237 = vmatprep.subr.msk.bf16.mxu0 %vm908_vm0, %v3482_v0  ;;  %v910_v1 = vsel %vm908_vm0, %v3482_v0, 0  ;;  %v3563_v3 = vld [vmem:[%s5908_s2 + $0x4] sm:$0x3]  ;;  %vm422_vm1 = vsmask.f32 3328  ;;  %v4384_v4 = vsel %vm908_vm0, %v421_v2, 0 }
   0xe   : > { %4236 = vmatpush3.bf16.msra.mxu1 %v910_v1  ;;  %3930 = vmatpush3.bf16.msra.mxu0 %v910_v1  ;;  %s6120_s15 = smov (!%p315_p4, %s4306_s15), 1  ;;  %vm423_vm2 = vsmask.f32 7440  ;;  %v4387_v5 = vsel %vm908_vm0, %v3563_v3, 0  ;;  %vm859_vm3 = vcmask 31744   ;;  %v5954_v32 = vmov 0 }
   0xf   : > { %4239 = vmatprep.subr.msk.bf16.mxu1 %vm908_vm0, %v421_v2  ;;  %4240 = vmatprep.subr.msk.bf16.mxu0 %vm908_vm0, %v3563_v3  ;;  %s4247_s25 = smul.u32 216, %s6120_s15  ;;  %vm4426_vm4 = vmor %vm422_vm1, %vm423_vm2  ;;  %vm1381_vm5 = vcmask 1042432   ;;  %vm1382_vm6 = vcmask 1046532   ;;  %vm3281_vm8 = vcmask 60416  }
  0x10   : > { %v5955_v32 = vsel %vm4426_vm4, 4294967295, %v5954_v32  ;;  %vm4749_vm7 = vmor %vm1381_vm5, %vm1382_vm6 }
  0x11   : > { %s4381_s28 = scalar_lea.vmem %s5906_s0, %s4247_s25  ;;  %5956 = vst [vmem:[#allocation2_spill] sm:$0xff] %v5955_v32  ;;  %s3742_s11 = sadd.s32 192, %s4247_s25 }
  0x12   : > { %v4390_v6 = vld [vmem:[%s4381_s28] sm:$0xf]  ;;  %v4393_v7 = vld [vmem:[%s4381_s28 + $0x4] sm:$0xf]  ;;  %v4396_v8 = vld [vmem:[%s4381_s28 + $0x8] sm:$0x1]  ;;  %s5056_s14 = scalar_lea.vmem %s5907_s1, %s3742_s11 }
  0x13   : > { %v426_v9 = vshrl.u32 %v4390_v6, 16  ;;  %v429_v10 = vshll.u32 %v4390_v6, 16  ;;  %v435_v11 = vshll.u32 %v4393_v7, 16  ;;  %v439_v12 = vshrl.u32 %v4393_v7, 16  ;;  %v4403_v13 = vld [vmem:[%s4381_s28 + $0x60] sm:$0xf] }
  0x14   : > { %v445_v14 = vshll.u32 %v4396_v8, 16  ;;  %v4408_v16 = vld [vmem:[%s4381_s28 + $0x64] sm:$0xf]  ;;  %v4411_v17 = vld [vmem:[%s4381_s28 + $0x68] sm:$0x1]  ;;  %v618_v23 = vshrl.u32 %v4403_v13, 16 }
  0x15   : > { %v428_v18 = vrot.slane %v426_v9, 4  ;;  %v431_v19 = vrot.slane %v429_v10, 5  ;;  %v437_v20 = vrot.slane %v435_v11, 5  ;;  %v441_v21 = vrot.slane %v439_v12, 4  ;;  %v4419_v30 = vld [vmem:[%s4381_s28 + $0xc] sm:$0xf] }
  0x16   : > { %v447_v22 = vrot.slane %v445_v14, 5  ;;  %v621_v24 = vshll.u32 %v4403_v13, 16  ;;  %v627_v25 = vshll.u32 %v4408_v16, 16  ;;  %v631_v28 = vshrl.u32 %v4408_v16, 16  ;;  %v4422_v31 = vld [vmem:[%s4381_s28 + $0x10] sm:$0xf] }
  0x17   : > { %v432_v26 = vor.u32 %v431_v19, %v428_v18  ;;  %v442_v27 = vor.u32 %v441_v21, %v437_v20  ;;  %v637_v29 = vshll.u32 %v4411_v17, 16  ;;  %v620_v33 = vrot.slane %v618_v23, 4  ;;  %v4433_v42 = vld [vmem:[%s4381_s28 + $0x14] sm:$0x1]  ;;  %v4444_v54 = vld [vmem:[%s4381_s28 + $0x6c] sm:$0xf] }
  0x18   : > { %v623_v34 = vrot.slane %v621_v24, 5  ;;  %v629_v35 = vrot.slane %v627_v25, 5  ;;  %v633_v39 = vrot.slane %v631_v28, 4  ;;  %v450_v43 = vshrl.u32 %v4419_v30, 16  ;;  %5957 = vst [vmem:[#allocation3_spill] sm:$0xff] %v4444_v54  ;;  %s3743_s25 = sshll.u32 %s6120_s15, 7 }
  0x19   : > { %v433_v37 = vrot.slane %v432_v26, 4  ;;  %v443_v38 = vrot.slane %v442_v27, 4  ;;  %v639_v40 = vrot.slane %v637_v29, 5  ;;  %v453_v44 = vshll.u32 %v4419_v30, 16  ;;  %v4448_v59 = vld [vmem:[%s4381_s28 + $0x70] sm:$0xf]  ;;  %s5727_s27 = scalar_lea.vmem %s5910_s4, %s3743_s25 }
  0x1a   : > { %v624_v41 = vor.u32 %v623_v34, %v620_v33  ;;  %v459_v45 = vshll.u32 %v4422_v31, 16  ;;  %v634_v48 = vor.u32 %v633_v39, %v629_v35  ;;  %v463_v49 = vshrl.u32 %v4422_v31, 16  ;;  %v4456_v0 = vld [vmem:[%s4381_s28 + $0x74] sm:$0x1]  ;;  %v4462_v10 = vld [vmem:[%s4381_s28 + $0x18] sm:$0xf] }
  0x1b   : > { %v438_v46 = vsel %vm4426_vm4, %v433_v37, %v437_v20  ;;  %v448_v47 = vsel %vm4426_vm4, %v443_v38, %v447_v22  ;;  %v452_v52 = vrot.slane %v450_v43, 4  ;;  %v455_v53 = vrot.slane %v453_v44, 5  ;;  %5958 = vst [vmem:[#allocation4_spill] sm:$0xff] %v4456_v0  ;;  %v4471_v23 = vld [vmem:[%s4381_s28 + $0x1c] sm:$0xf] }
  0x1c   : > { %v3483_v50 = vcombine.low %v438_v46, %v448_v47  ;;  %v625_v51 = vrot.slane %v624_v41, 4  ;;  %v635_v55 = vrot.slane %v634_v48, 4  ;;  %v461_v56 = vrot.slane %v459_v45, 5  ;;  %v4478_v27 = vld [vmem:[%s4381_s28 + $0x20] sm:$0x1] }
  0x1d   : > { %v465_v57 = vrot.slane %v463_v49, 4  ;;  %v469_v58 = vshll.u32 %v4433_v42, 16  ;;  %v456_v61 = vor.u32 %v455_v53, %v452_v52  ;;  %v642_v9 = vshrl.u32 %v4444_v54, 16  ;;  %v4485_v37 = vld [vmem:[%s4381_s28 + $0x78] sm:$0xf] }
  0x1e   : > { %3931 = vmatprep.mubr.msk.bf16.mxu0 %vm859_vm3, %v3483_v50  ;;  %v630_v60 = vsel %vm4426_vm4, %v625_v51, %v629_v35  ;;  %v640_v1 = vsel %vm4426_vm4, %v635_v55, %v639_v40  ;;  %v645_v14 = vshll.u32 %v4444_v54, 16  ;;  %v651_v18 = vshll.u32 %v4448_v59, 16  ;;  %5960 = vst [vmem:[#allocation6_spill] sm:$0xff] %v4485_v37  ;;  %v4493_v43 = vld [vmem:[%s5908_s2 + $0x8] sm:$0x3] }
  0x1f   : > { %v466_v2 = vor.u32 %v465_v57, %v461_v56  ;;  %v471_v3 = vrot.slane %v469_v58, 5  ;;  %v4464_v11 = vcombine.low %v630_v60, %v640_v1  ;;  %v457_v12 = vrot.slane %v456_v61, 4  ;;  %v4498_v48 = vld [vmem:[%s4381_s28 + $0x7c] sm:$0xf]  ;;  %v4506_v58 = vld [vmem:[%s4381_s28 + $0x80] sm:$0x1] }
  0x20   : > { %v644_v20 = vrot.slane %v642_v9, 4  ;;  %v655_v21 = vshrl.u32 %v4448_v59, 16  ;;  %v661_v22 = vshll.u32 %v4456_v0, 16  ;;  %v647_v25 = vrot.slane %v645_v14, 5  ;;  %5962 = vst [vmem:[#allocation8_spill] sm:$0xff] %v4498_v48  ;;  %5963 = vst [vmem:[#allocation9_spill] sm:$0xff] %v4506_v58 }
  0x21   : > { %5959 = vst [vmem:[#allocation5_spill] sm:$0xff] %v4464_v11  ;;  %v467_v19 = vrot.slane %v466_v2, 4  ;;  %3947 = vmatprep.mubr.msk.bf16.mxu1 %vm859_vm3, %v4464_v11  ;;  %v462_v24 = vsel %vm4426_vm4, %v457_v12, %v461_v56  ;;  %v653_v26 = vrot.slane %v651_v18, 5  ;;  %v474_v28 = vshrl.u32 %v4462_v10, 16  ;;  %v4520_v18 = vld [vmem:[%s4381_s28 + $0x28] sm:$0xf] }
  0x22   : > { %v657_v33 = vrot.slane %v655_v21, 4  ;;  %v663_v34 = vrot.slane %v661_v22, 5  ;;  %v477_v35 = vshll.u32 %v4462_v10, 16  ;;  %v648_v39 = vor.u32 %v647_v25, %v644_v20 }
  0x23   : > { %v472_v29 = vsel %vm4426_vm4, %v467_v19, %v471_v3  ;;  %v476_v40 = vrot.slane %v474_v28, 4  ;;  %v483_v41 = vshll.u32 %v4471_v23, 16  ;;  %v487_v46 = vshrl.u32 %v4471_v23, 16  ;;  %v4512_v3 = vld [vmem:[%s4381_s28 + $0x24] sm:$0xf] }
  0x24   : > { %v4487_v38 = vcombine.low %v462_v24, %v472_v29  ;;  %v658_v44 = vor.u32 %v657_v33, %v653_v26  ;;  %v479_v45 = vrot.slane %v477_v35, 5  ;;  %v493_v47 = vshll.u32 %v4478_v27, 16  ;;  %v4528_v24 = vld [vmem:[%s5908_s2 + $0x6] sm:$0x3]  ;;  %v4533_v29 = vld [vmem:[%s4381_s28 + $0x2c] sm:$0x1] }
  0x25   : > { %v649_v49 = vrot.slane %v648_v39, 4  ;;  %v485_v50 = vrot.slane %v483_v41, 5  ;;  %v666_v51 = vshrl.u32 %v4485_v37, 16  ;;  %v669_v52 = vshll.u32 %v4485_v37, 16  ;;  %v4541_v41 = vld [vmem:[%s4381_s28 + $0x84] sm:$0xf] }
  0x26   : > { %5961 = vst [vmem:[#allocation7_spill] sm:$0xff] %v4487_v38  ;;  %3932 = vmatmul.mubr.msk.bf16.vlgmr.msra.gmra.mxu0 %vm859_vm3, %v4487_v38  ;;  %v659_v53 = vrot.slane %v658_v44, 4  ;;  %v480_v55 = vor.u32 %v479_v45, %v476_v40  ;;  %v489_v56 = vrot.slane %v487_v46, 4  ;;  %v495_v57 = vrot.slane %v493_v47, 5  ;;  %v4688_v38 = vld [vmem:[%s4381_s28 + $0xb0] sm:$0x1] }
  0x27   : > { %3998 = vmatpush3.bf16.msra.mxu0 %v4387_v5  ;;  %v654_v60 = vsel %vm4426_vm4, %v649_v49, %v653_v26  ;;  %v668_v61 = vrot.slane %v666_v51, 4  ;;  %v671_v1 = vrot.slane %v669_v52, 5  ;;  %v675_v2 = vshll.u32 %v4498_v48, 16  ;;  %v4548_v49 = vld [vmem:[%s4381_s28 + $0x88] sm:$0xf]  ;;  %5975 = vst [vmem:[#allocation21_spill] sm:$0xff] %v4688_v38 }
  0x28   : > { %4242 = vmatprep.subr.msk.bf16.mxu0 %vm908_vm0, %v4493_v43  ;;  %v664_v5 = vsel %vm4426_vm4, %v659_v53, %v663_v34  ;;  %v481_v9 = vrot.slane %v480_v55, 4  ;;  %v490_v12 = vor.u32 %v489_v56, %v485_v50  ;;  %v679_v14 = vshrl.u32 %v4498_v48, 16  ;;  %v4710_v48 = vld [vmem:[%s4381_s28 + $0x5c] sm:$0x1] }
  0x29   : > { %v4522_v19 = vcombine.low %v654_v60, %v664_v5  ;;  %v672_v20 = vor.u32 %v671_v1, %v668_v61  ;;  %v677_v21 = vrot.slane %v675_v2, 5  ;;  %v685_v22 = vshll.u32 %v4506_v58, 16 }
  0x2a   : > { %v486_v25 = vsel %vm4426_vm4, %v481_v9, %v485_v50  ;;  %v491_v26 = vrot.slane %v490_v12, 4  ;;  %v681_v28 = vrot.slane %v679_v14, 4  ;;  %v498_v33 = vshrl.u32 %v4512_v3, 16  ;;  %v4567_v9 = vld [vmem:[%s4381_s28 + $0x30] sm:$0xf] }
  0x2b   : > { %5964 = vst [vmem:[#allocation10_spill] sm:$0xff] %v4522_v19  ;;  %3948 = vmatmul.mubr.msk.bf16.vlgmr.msra.gmra.mxu1 %vm859_vm3, %v4522_v19  ;;  %v673_v34 = vrot.slane %v672_v20, 4  ;;  %v687_v35 = vrot.slane %v685_v22, 5  ;;  %v501_v39 = vshll.u32 %v4512_v3, 16  ;;  %v507_v40 = vshll.u32 %v4520_v18, 16 }
  0x2c   : > { %3964 = vmatpush3.bf16.msra.mxu1 %v4384_v4  ;;  %v496_v44 = vsel %vm4426_vm4, %v491_v26, %v495_v57  ;;  %v682_v45 = vor.u32 %v681_v28, %v677_v21  ;;  %v500_v46 = vrot.slane %v498_v33, 4  ;;  %v511_v47 = vshrl.u32 %v4520_v18, 16  ;;  %v4558_v57 = vld [vmem:[%s4381_s28 + $0x8c] sm:$0x1]  ;;  %v4572_v22 = vld [vmem:[%s4381_s28 + $0x34] sm:$0xf] }
  0x2d   : > { %v4550_v50 = vcombine.low %v486_v25, %v496_v44  ;;  %v678_v51 = vsel %vm4426_vm4, %v673_v34, %v677_v21  ;;  %v503_v52 = vrot.slane %v501_v39, 5  ;;  %v509_v53 = vrot.slane %v507_v40, 5  ;;  %4241 = vmatprep.subr.msk.bf16.mxu1 %vm908_vm0, %v4528_v24 }
  0x2e   : > { %v683_v4 = vrot.slane %v682_v45, 4  ;;  %v513_v55 = vrot.slane %v511_v47, 4  ;;  %v517_v56 = vshll.u32 %v4533_v29, 16  ;;  %v690_v60 = vshrl.u32 %v4541_v41, 16 }
  0x2f   : > { %5965 = vst [vmem:[#allocation11_spill] sm:$0xff] %v4550_v50  ;;  %3935 = vmatprep.mubr.msk.bf16.mxu0 %vm859_vm3, %v4550_v50  ;;  %v504_v61 = vor.u32 %v503_v52, %v500_v46  ;;  %v693_v1 = vshll.u32 %v4541_v41, 16  ;;  %v699_v2 = vshll.u32 %v4548_v49, 16  ;;  %v703_v5 = vshrl.u32 %v4548_v49, 16  ;;  %v4583_v46 = vld [vmem:[%s4381_s28 + $0x38] sm:$0x1] }
  0x30   : > { %v688_v12 = vsel %vm4426_vm4, %v683_v4, %v687_v35  ;;  %v514_v14 = vor.u32 %v513_v55, %v509_v53  ;;  %v519_v20 = vrot.slane %v517_v56, 5  ;;  %v692_v21 = vrot.slane %v690_v60, 4  ;;  %v4588_v52 = vld [vmem:[%s4381_s28 + $0x90] sm:$0xf] }
  0x31   : > { %v4574_v25 = vcombine.low %v678_v51, %v688_v12  ;;  %v505_v26 = vrot.slane %v504_v61, 4  ;;  %v695_v28 = vrot.slane %v693_v1, 5  ;;  %v701_v33 = vrot.slane %v699_v2, 5  ;;  %v4593_v61 = vld [vmem:[%s4381_s28 + $0x94] sm:$0xf] }
  0x32   : > { %v515_v34 = vrot.slane %v514_v14, 4  ;;  %v705_v39 = vrot.slane %v703_v5, 4  ;;  %v709_v40 = vshll.u32 %v4558_v57, 16  ;;  %v522_v44 = vshrl.u32 %v4567_v9, 16 }
  0x33   : > { %5966 = vst [vmem:[#allocation12_spill] sm:$0xff] %v4574_v25  ;;  %3951 = vmatprep.mubr.msk.bf16.mxu1 %vm859_vm3, %v4574_v25  ;;  %v510_v35 = vsel %vm4426_vm4, %v505_v26, %v509_v53  ;;  %v696_v45 = vor.u32 %v695_v28, %v692_v21  ;;  %v525_v47 = vshll.u32 %v4567_v9, 16  ;;  %v531_v51 = vshll.u32 %v4572_v22, 16  ;;  %v4639_v25 = vld [vmem:[%s4381_s28 + $0xa0] sm:$0xf] }
  0x34   : > { %v520_v4 = vsel %vm4426_vm4, %v515_v34, %v519_v20  ;;  %v706_v55 = vor.u32 %v705_v39, %v701_v33  ;;  %v711_v56 = vrot.slane %v709_v40, 5  ;;  %v524_v60 = vrot.slane %v522_v44, 4  ;;  %v4605_v34 = vld [vmem:[%s4381_s28 + $0x98] sm:$0x1]  ;;  %v4610_v44 = vld [vmem:[%s4381_s28 + $0x3c] sm:$0xf] }
  0x35   : > { %v4595_v53 = vcombine.low %v510_v35, %v520_v4  ;;  %v697_v1 = vrot.slane %v696_v45, 4  ;;  %v527_v2 = vrot.slane %v525_v47, 5  ;;  %v533_v5 = vrot.slane %v531_v51, 5  ;;  %v4615_v4 = vld [vmem:[%s4381_s28 + $0x40] sm:$0xf] }
  0x36   : > { %v707_v12 = vrot.slane %v706_v55, 4  ;;  %v535_v14 = vshrl.u32 %v4572_v22, 16  ;;  %v541_v21 = vshll.u32 %v4583_v46, 16  ;;  %v714_v20 = vshrl.u32 %v4588_v52, 16 }
  0x37   : > { %5967 = vst [vmem:[#allocation13_spill] sm:$0xff] %v4595_v53  ;;  %3936 = vmatmul.mubr.msk.bf16.gmra.mxu0 %vm859_vm3, %v4595_v53  ;;  %v702_v26 = vsel %vm4426_vm4, %v697_v1, %v701_v33  ;;  %v528_v28 = vor.u32 %v527_v2, %v524_v60  ;;  %v717_v39 = vshll.u32 %v4588_v52, 16  ;;  %v723_v40 = vshll.u32 %v4593_v61, 16 }
  0x38   : > { %v712_v35 = vsel %vm4426_vm4, %v707_v12, %v711_v56  ;;  %v537_v45 = vrot.slane %v535_v14, 4  ;;  %v543_v47 = vrot.slane %v541_v21, 5  ;;  %v716_v51 = vrot.slane %v714_v20, 4  ;;  %v4627_v14 = vld [vmem:[%s4381_s28 + $0x44] sm:$0x1] }
  0x39   : > { %v4617_v33 = vcombine.low %v702_v26, %v712_v35  ;;  %v529_v55 = vrot.slane %v528_v28, 4  ;;  %v719_v60 = vrot.slane %v717_v39, 5  ;;  %v725_v1 = vrot.slane %v723_v40, 5  ;;  %v4632_v26 = vld [vmem:[%s4381_s28 + $0x9c] sm:$0xf] }
  0x3a   : > { %v538_v2 = vor.u32 %v537_v45, %v533_v5  ;;  %v727_v36 = vshrl.u32 %v4593_v61, 16  ;;  %v733_v63 = vshll.u32 %v4605_v34, 16  ;;  %v546_v15 = vshrl.u32 %v4610_v44, 16 }
  0x3b   : > { %5968 = vst [vmem:[#allocation14_spill] sm:$0xff] %v4617_v33  ;;  %3952 = vmatmul.mubr.msk.bf16.gmra.mxu1 %vm859_vm3, %v4617_v33  ;;  %v534_v56 = vsel %vm4426_vm4, %v529_v55, %v533_v5  ;;  %v720_v12 = vor.u32 %v719_v60, %v716_v51  ;;  %v549_v21 = vshll.u32 %v4610_v44, 16  ;;  %v555_v20 = vshll.u32 %v4615_v4, 16 }
  0x3c   : > { %v539_v28 = vrot.slane %v538_v2, 4  ;;  %v729_v39 = vrot.slane %v727_v36, 4  ;;  %v735_v40 = vrot.slane %v733_v63, 5  ;;  %v548_v35 = vrot.slane %v546_v15, 4 }
  0x3d   : > { %v721_v45 = vrot.slane %v720_v12, 4  ;;  %v551_v62 = vrot.slane %v549_v21, 5  ;;  %v557_v33 = vrot.slane %v555_v20, 5  ;;  %v559_v5 = vshrl.u32 %v4615_v4, 16  ;;  %v4647_v21 = vld [vmem:[%s4381_s28 + $0xa4] sm:$0x1] }
  0x3e   : > { %v544_v51 = vsel %vm4426_vm4, %v539_v28, %v543_v47  ;;  %v730_v55 = vor.u32 %v729_v39, %v725_v1  ;;  %v565_v60 = vshll.u32 %v4627_v14, 16  ;;  %v738_v2 = vshrl.u32 %v4632_v26, 16  ;;  %5970 = vst [vmem:[#allocation16_spill] sm:$0xff] %v4647_v21  ;;  %v4650_v20 = vld [vmem:[%s4381_s28 + $0x48] sm:$0xf] }
  0x3f   : > { %v4642_v36 = vcombine.low %v534_v56, %v544_v51  ;;  %v726_v15 = vsel %vm4426_vm4, %v721_v45, %v725_v1  ;;  %v552_v63 = vor.u32 %v551_v62, %v548_v35  ;;  %v561_v12 = vrot.slane %v559_v5, 4 }
  0x40   : > { %v731_v47 = vrot.slane %v730_v55, 4  ;;  %v567_v28 = vrot.slane %v565_v60, 5  ;;  %v740_v39 = vrot.slane %v738_v2, 4  ;;  %v741_v19 = vshll.u32 %v4632_v26, 16  ;;  %v4661_v55 = vld [vmem:[%s4381_s28 + $0x4c] sm:$0xf] }
  0x41   : > { %5969 = vst [vmem:[#allocation15_spill] sm:$0xff] %v4642_v36  ;;  %3939 = vmatprep.mubr.msk.bf16.mxu0 %vm859_vm3, %v4642_v36  ;;  %v553_v56 = vrot.slane %v552_v63, 4  ;;  %v562_v51 = vor.u32 %v561_v12, %v557_v33  ;;  %v747_v1 = vshll.u32 %v4639_v25, 16  ;;  %v751_v62 = vshrl.u32 %v4639_v25, 16  ;;  %v4669_v36 = vld [vmem:[%s4381_s28 + $0x50] sm:$0x1] }
  0x42   : > { %v736_v35 = vsel %vm4426_vm4, %v731_v47, %v735_v40  ;;  %v743_v45 = vrot.slane %v741_v19, 5  ;;  %v757_v5 = vshll.u32 %v4647_v21, 16  ;;  %v570_v60 = vshrl.u32 %v4650_v20, 16  ;;  %v4672_v47 = vld [vmem:[%s4381_s28 + $0xa8] sm:$0xf] }
  0x43   : > { %v4664_v2 = vcombine.low %v726_v15, %v736_v35  ;;  %v558_v63 = vsel %vm4426_vm4, %v553_v56, %v557_v33  ;;  %v563_v12 = vrot.slane %v562_v51, 4  ;;  %v749_v11 = vrot.slane %v747_v1, 5  ;;  %5972 = vst [vmem:[#allocation18_spill] sm:$0xff] %v4672_v47 }
  0x44   : > { %v744_v53 = vor.u32 %v743_v45, %v740_v39  ;;  %v753_v50 = vrot.slane %v751_v62, 4  ;;  %v759_v40 = vrot.slane %v757_v5, 5  ;;  %v572_v19 = vrot.slane %v570_v60, 4  ;;  %v4685_v45 = vld [vmem:[%s4381_s28 + $0xac] sm:$0xf] }
  0x45   : > { %5971 = vst [vmem:[#allocation17_spill] sm:$0xff] %v4664_v2  ;;  %3955 = vmatprep.mubr.msk.bf16.mxu1 %vm859_vm3, %v4664_v2  ;;  %v568_v15 = vsel %vm4426_vm4, %v563_v12, %v567_v28  ;;  %v573_v33 = vshll.u32 %v4650_v20, 16  ;;  %v579_v56 = vshll.u32 %v4661_v55, 16  ;;  %v583_v51 = vshrl.u32 %v4661_v55, 16  ;;  %5974 = vst [vmem:[#allocation20_spill] sm:$0xff] %v4685_v45 }
  0x46   : > { %v4681_v1 = vcombine.low %v558_v63, %v568_v15  ;;  %v745_v39 = vrot.slane %v744_v53, 4  ;;  %v754_v62 = vor.u32 %v753_v50, %v749_v11  ;;  %v589_v35 = vshll.u32 %v4669_v36, 16 }
  0x47   : > { %v575_v5 = vrot.slane %v573_v33, 5  ;;  %v581_v60 = vrot.slane %v579_v56, 5  ;;  %v585_v2 = vrot.slane %v583_v51, 4  ;;  %v762_v28 = vshrl.u32 %v4672_v47, 16  ;;  %v4698_v51 = vld [vmem:[%s4381_s28 + $0x54] sm:$0xf] }
  0x48   : > { %5973 = vst [vmem:[#allocation19_spill] sm:$0xff] %v4681_v1  ;;  %3940 = vmatmul.mubr.msk.bf16.gmra.mxu0 %vm859_vm3, %v4681_v1  ;;  %v750_v53 = vsel %vm4426_vm4, %v745_v39, %v749_v11  ;;  %v755_v50 = vrot.slane %v754_v62, 4  ;;  %v591_v63 = vrot.slane %v589_v35, 5  ;;  %v765_v12 = vshll.u32 %v4672_v47, 16  ;;  %v4705_v62 = vld [vmem:[%s4381_s28 + $0x58] sm:$0xf] }
  0x49   : > { %v576_v15 = vor.u32 %v575_v5, %v572_v19  ;;  %v586_v58 = vor.u32 %v585_v2, %v581_v60  ;;  %v764_v33 = vrot.slane %v762_v28, 4  ;;  %v771_v56 = vshll.u32 %v4685_v45, 16 }
  0x4a   : > { %v760_v1 = vsel %vm4426_vm4, %v755_v50, %v759_v40  ;;  %v767_v37 = vrot.slane %v765_v12, 5  ;;  %v775_v11 = vshrl.u32 %v4685_v45, 16  ;;  %v781_v39 = vshll.u32 %v4688_v38, 16 }
  0x4b   : > { %v4707_v2 = vcombine.low %v750_v53, %v760_v1  ;;  %v577_v19 = vrot.slane %v576_v15, 4  ;;  %v587_v35 = vrot.slane %v586_v58, 4  ;;  %v773_v5 = vrot.slane %v771_v56, 5 }
  0x4c   : > { %v768_v28 = vor.u32 %v767_v37, %v764_v33  ;;  %v777_v0 = vrot.slane %v775_v11, 4  ;;  %v783_v54 = vrot.slane %v781_v39, 5  ;;  %v594_v40 = vshrl.u32 %v4698_v51, 16  ;;  %v4722_v37 = vld [vmem:[%s4381_s28 + $0xb4] sm:$0xf] }
  0x4d   : > { %5976 = vst [vmem:[#allocation22_spill] sm:$0xff] %v4707_v2  ;;  %3956 = vmatmul.mubr.msk.bf16.gmra.mxu1 %vm859_vm3, %v4707_v2  ;;  %v582_v50 = vsel %vm4426_vm4, %v577_v19, %v581_v60  ;;  %v592_v1 = vsel %vm4426_vm4, %v587_v35, %v591_v63  ;;  %v597_v58 = vshll.u32 %v4698_v51, 16  ;;  %v603_v53 = vshll.u32 %v4705_v62, 16  ;;  %5977 = vst [vmem:[#allocation23_spill] sm:$0xff] %v4722_v37  ;;  %v4727_v11 = vld [vmem:[%s4381_s28 + $0xb8] sm:$0xf] }
  0x4e   : > { %v4724_v12 = vcombine.low %v582_v50, %v592_v1  ;;  %v769_v15 = vrot.slane %v768_v28, 4  ;;  %v778_v33 = vor.u32 %v777_v0, %v773_v5  ;;  %v596_v56 = vrot.slane %v594_v40, 4 }
  0x4f   : > { %v599_v39 = vrot.slane %v597_v58, 5  ;;  %v605_v2 = vrot.slane %v603_v53, 5  ;;  %v607_v60 = vshrl.u32 %v4705_v62, 16  ;;  %v613_v63 = vshll.u32 %v4710_v48, 16  ;;  %v4738_v58 = vld [vmem:[%s4381_s28 + $0xbc] sm:$0x1] }
  0x50   : > { %5978 = vst [vmem:[#allocation24_spill] sm:$0xff] %v4724_v12  ;;  %3943 = vmatprep.mubr.msk.bf16.mxu0 %vm859_vm3, %v4724_v12  ;;  %v774_v19 = vsel %vm4426_vm4, %v769_v15, %v773_v5  ;;  %v779_v35 = vrot.slane %v778_v33, 4  ;;  %v786_v28 = vshrl.u32 %v4722_v37, 16  ;;  %v789_v0 = vshll.u32 %v4722_v37, 16 }
  0x51   : > { %v600_v40 = vor.u32 %v599_v39, %v596_v56  ;;  %v609_v50 = vrot.slane %v607_v60, 4  ;;  %v615_v1 = vrot.slane %v613_v63, 5  ;;  %v795_v53 = vshll.u32 %v4727_v11, 16 }
  0x52   : > { %v784_v38 = vsel %vm4426_vm4, %v779_v35, %v783_v54  ;;  %v788_v47 = vrot.slane %v786_v28, 4  ;;  %v791_v12 = vrot.slane %v789_v0, 5  ;;  %v799_v45 = vshrl.u32 %v4727_v11, 16 }
  0x53   : > { %v4744_v5 = vcombine.low %v774_v19, %v784_v38  ;;  %v601_v15 = vrot.slane %v600_v40, 4  ;;  %v610_v33 = vor.u32 %v609_v50, %v605_v2  ;;  %v797_v21 = vrot.slane %v795_v53, 5 }
  0x54   : > { %v792_v37 = vor.u32 %v791_v12, %v788_v47  ;;  %v801_v56 = vrot.slane %v799_v45, 4  ;;  %v805_v39 = vshll.u32 %v4738_v58, 16  ;;  %v3547_v54 = vrot.slane %v4390_v6, 9 }
  0x55   : > { %3959 = vmatprep.mubr.msk.bf16.mxu1 %vm859_vm3, %v4744_v5  ;;  %v606_v38 = vsel %vm4426_vm4, %v601_v15, %v605_v2  ;;  %v611_v63 = vrot.slane %v610_v33, 4  ;;  %v1386_v47 = vrot.slane %v4393_v7, 5  ;;  %v4761_v45 = vcombine.low %v4419_v30, %v4422_v31 }
  0x56   : > { %v793_v12 = vrot.slane %v792_v37, 4  ;;  %v802_v19 = vor.u32 %v801_v56, %v797_v21  ;;  %v807_v35 = vrot.slane %v805_v39, 5  ;;  %v3548_v28 = vrot.slane %v4419_v30, 9 }
  0x57   : > { %v616_v0 = vsel %vm4426_vm4, %v611_v63, %v615_v1  ;;  %v1387_v40 = vsel %vm4749_vm7, %v3547_v54, %v1386_v47  ;;  %v1388_v50 = vrot.slane %v1386_v47, 4  ;;  %v5981_v2 = vrot.slane %v4422_v31, 5 }
  0x58   : > { %v4770_v15 = vcombine.low %v606_v38, %v616_v0  ;;  %v798_v33 = vsel %vm4426_vm4, %v793_v12, %v797_v21  ;;  %v803_v37 = vrot.slane %v802_v19, 4  ;;  %v5983_v1 = vrot.slane %v4396_v8, 5 }
  0x59   : > { %v1395_v53 = vrot.slane %v5981_v2, 4  ;;  %v5982_v56 = vmov %v5981_v2  ;;  %v5984_v54 = vrot.slane %v4433_v42, 5  ;;  %v4788_v63 = vcombine.low %v4462_v10, %v4471_v23 }
  0x5a   : > { %v1394_v30 = vsel %vm4749_vm7, %v3548_v28, %v5982_v56  ;;  %v1390_v39 = vsel %vm4749_vm7, %v1388_v50, %v5983_v1  ;;  %v3549_v21 = vrot.slane %v4462_v10, 9  ;;  %3944 = vmatmul.mubr.msk.bf16.gmra.mxu0 %vm859_vm3, %v4770_v15  ;;  %v808_v8 = vsel %vm4426_vm4, %v803_v37, %v807_v35 }
  0x5b   : > { %v1397_v38 = vsel %vm4749_vm7, %v1395_v53, %v5984_v54  ;;  %v3564_v31 = vcombine.low %v1387_v40, %v1390_v39  ;;  %v1400_v42 = vrot.slane %v4471_v23, 5  ;;  %v4798_v12 = vcombine.low %v798_v33, %v808_v8 }
  0x5c   : > { %v4795_v47 = vcombine.low %v1394_v30, %v1397_v38  ;;  %v1403_v19 = vrot.slane %v4478_v27, 5  ;;  %v1407_v0 = vrot.slane %v4520_v18, 5  ;;  %v3550_v35 = vrot.slane %v4512_v3, 9 }
  0x5d   : > { %5985 = vst [vmem:[#allocation25_spill] sm:$0xff] %v4798_v12  ;;  %3999 = vmatprep.mubr.msk.bf16.mxu0 %vm859_vm3, %v3564_v31  ;;  %v1401_v10 = vsel %vm4749_vm7, %v3549_v21, %v1400_v42  ;;  %v1402_v28 = vrot.slane %v1400_v42, 4  ;;  %3960 = vmatmul.mubr.msk.bf16.gmra.mxu1 %vm859_vm3, %v4798_v12  ;;  %v3551_v40 = vrot.slane %v4567_v9, 9  ;;  %v1414_v23 = vrot.slane %v4572_v22, 5 }
  0x5e   : > { %v5986_v27 = vcombine.low %v4390_v6, %v4393_v7  ;;  %v1409_v2 = vrot.slane %v1407_v0, 4  ;;  %v1410_v53 = vrot.slane %v4533_v29, 5  ;;  %v1417_v33 = vrot.slane %v4583_v46, 5  ;;  %v4833_v46 = vld [vmem:[%s5908_s2 + $0xc] sm:$0x3] }
  0x5f   : > { %v1404_v50 = vsel %vm4749_vm7, %v1402_v28, %v1403_v19  ;;  %v1416_v56 = vrot.slane %v1414_v23, 4  ;;  %v2029_v30 = vsel %vm908_vm0, %v4493_v43, 0  ;;  %v1421_v1 = vrot.slane %v4615_v4, 5  ;;  %v4850_v19 = vld [vmem:[%s5908_s2 + $0xa] sm:$0x3] }
  0x60   : > { %3965 = vmatprep.mubr.msk.bf16.mxu1 %vm859_vm3, %v5986_v27  ;;  %v4818_v37 = vcombine.low %v1401_v10, %v1404_v50  ;;  %v1801_v6 = vsel %vm908_vm0, %v4528_v24, 0  ;;  %v1408_v7 = vsel %vm4749_vm7, %v3550_v35, %v1407_v0  ;;  %v1415_v39 = vsel %vm4749_vm7, %v3551_v40, %v1414_v23 }
  0x61   : > { %v1428_v29 = vrot.slane %v4661_v55, 5  ;;  %v1411_v43 = vsel %vm4749_vm7, %v1409_v2, %v1410_v53  ;;  %v1418_v24 = vsel %vm4749_vm7, %v1416_v56, %v1417_v33  ;;  %v3552_v54 = vrot.slane %v4610_v44, 9 }
  0x62   : > { %4000 = vmatmul.mubr.msk.bf16.vlgmr.msra.gmra.mxu0 %vm859_vm3, %v4795_v47  ;;  %v1424_v38 = vrot.slane %v4627_v14, 5  ;;  %v1423_v21 = vrot.slane %v1421_v1, 4  ;;  %v3553_v8 = vrot.slane %v4650_v20, 9  ;;  %v1431_v42 = vrot.slane %v4669_v36, 5 }
  0x63   : > { %4066 = vmatpush3.bf16.msra.mxu0 %v2029_v30  ;;  %4003 = vmatprep.mubr.msk.bf16.mxu0 %vm859_vm3, %v4818_v37  ;;  %v1430_v31 = vrot.slane %v1428_v29, 4  ;;  %v4858_v14 = vcombine.low %v1408_v7, %v1411_v43  ;;  %v4860_v10 = vcombine.low %v1415_v39, %v1418_v24  ;;  %v1422_v36 = vsel %vm4749_vm7, %v3552_v54, %v1421_v1 }
  0x64   : > { %4244 = vmatprep.subr.msk.bf16.mxu0 %vm908_vm0, %v4833_v46  ;;  %v1425_v28 = vsel %vm4749_vm7, %v1423_v21, %v1424_v38  ;;  %v1429_v0 = vsel %vm4749_vm7, %v3553_v8, %v1428_v29  ;;  %v1435_v40 = vrot.slane %v4705_v62, 5  ;;  %v1445_v23 = vrot.slane %v4411_v17, 5  ;;  %v5987_v8 = vld [vmem:[#allocation16_spill] sm:$0xff] }
  0x65   : > { %3966 = vmatmul.mubr.msk.bf16.vlgmr.msra.gmra.mxu1 %vm859_vm3, %v4761_v45  ;;  %v1432_v35 = vsel %vm4749_vm7, %v1430_v31, %v1431_v42  ;;  %v3554_v27 = vrot.slane %v4698_v51, 9  ;;  %v3555_v50 = vrot.slane %v4403_v13, 9  ;;  %v1442_v2 = vrot.slane %v4408_v16, 5  ;;  %v5988_v42 = vld [vmem:[#allocation20_spill] sm:$0xff] }
  0x66   : > { %4032 = vmatpush3.bf16.msra.mxu1 %v1801_v6  ;;  %3969 = vmatprep.mubr.msk.bf16.mxu1 %vm859_vm3, %v4788_v63  ;;  %v4879_v53 = vcombine.low %v4512_v3, %v4520_v18  ;;  %v4883_v33 = vcombine.low %v4567_v9, %v4572_v22  ;;  %v4887_v56 = vcombine.low %v4610_v44, %v4615_v4  ;;  %v1438_v3 = vrot.slane %v4710_v48, 5 }
  0x67   : > { %4243 = vmatprep.subr.msk.bf16.mxu1 %vm908_vm0, %v4850_v19  ;;  %v4891_v17 = vcombine.low %v4650_v20, %v4661_v55  ;;  %v4895_v30 = vcombine.low %v1422_v36, %v1425_v28  ;;  %v4897_v1 = vcombine.low %v1429_v0, %v1432_v35  ;;  %v4902_v18 = vcombine.low %v4541_v41, %v4548_v49  ;;  %v5989_v36 = vld [vmem:[#allocation18_spill] sm:$0xff] }
  0x68   : > { %v1437_v9 = vrot.slane %v1435_v40, 4  ;;  %v3558_v22 = vrot.slane %v4541_v41, 9  ;;  %v1463_v44 = vrot.slane %v4548_v49, 5  ;;  %v1466_v4 = vrot.slane %v4558_v57, 5 }
  0x69   : > { %v1436_v20 = vsel %vm4749_vm7, %v3554_v27, %v1435_v40  ;;  %v1443_v48 = vsel %vm4749_vm7, %v3555_v50, %v1442_v2  ;;  %v1444_v55 = vrot.slane %v1442_v2, 4  ;;  %v4915_v6 = vcombine.low %v4588_v52, %v4593_v61  ;;  %v5990_v40 = vld [vmem:[#allocation21_spill] sm:$0xff] }
  0x6a   : > { %4004 = vmatmul.mubr.msk.bf16.gmra.mxu0 %vm859_vm3, %v4858_v14  ;;  %v1464_v41 = vsel %vm4749_vm7, %v3558_v22, %v1463_v44  ;;  %v1465_v49 = vrot.slane %v1463_v44, 4  ;;  %v3559_v57 = vrot.slane %v4588_v52, 9  ;;  %v1470_v7 = vrot.slane %v4593_v61, 5 }
  0x6b   : > { %4007 = vmatprep.mubr.msk.bf16.mxu0 %vm859_vm3, %v4860_v10  ;;  %v1449_v39 = vrot.slane %v4448_v59, 5  ;;  %v1473_v29 = vrot.slane %v4605_v34, 5  ;;  %v4929_v43 = vcombine.low %v4632_v26, %v4639_v25  ;;  %v3560_v24 = vrot.slane %v4632_v26, 9 }
  0x6c   : > { %v1439_v54 = vsel %vm4749_vm7, %v1437_v9, %v1438_v3  ;;  %v1467_v52 = vsel %vm4749_vm7, %v1465_v49, %v1466_v4  ;;  %v1471_v61 = vsel %vm4749_vm7, %v3559_v57, %v1470_v7  ;;  %v1472_v38 = vrot.slane %v1470_v7, 4  ;;  %v5991_v3 = vld [vmem:[#allocation23_spill] sm:$0xff]  ;;  %v5992_v57 = vld [vmem:[#allocation8_spill] sm:$0xff] }
  0x6d   : > { %3970 = vmatmul.mubr.msk.bf16.gmra.mxu1 %vm859_vm3, %v4879_v53  ;;  %v4938_v21 = vcombine.low %v1464_v41, %v1467_v52  ;;  %v1477_v34 = vrot.slane %v4639_v25, 5  ;;  %v1480_v31 = vrot.slane %v5987_v8, 5  ;;  %v4944_v28 = vcombine.low %v5989_v36, %v5988_v42 }
  0x6e   : > { %3973 = vmatprep.mubr.msk.bf16.mxu1 %vm859_vm3, %v4883_v33  ;;  %v1474_v26 = vsel %vm4749_vm7, %v1472_v38, %v1473_v29  ;;  %v3561_v0 = vrot.slane %v5989_v36, 9  ;;  %v1484_v35 = vrot.slane %v5988_v42, 5  ;;  %v1487_v27 = vrot.slane %v5990_v40, 5  ;;  %v5994_v42 = vld [vmem:[#allocation4_spill] sm:$0xff] }
  0x6f   : > { %v4953_v50 = vcombine.low %v1471_v61, %v1474_v26  ;;  %v1478_v25 = vsel %vm4749_vm7, %v3560_v24, %v1477_v34  ;;  %v1479_v2 = vrot.slane %v1477_v34, 4  ;;  %v4959_v9 = vcombine.low %v5991_v3, %v4727_v11 }
  0x70   : > { %v1485_v22 = vsel %vm4749_vm7, %v3561_v0, %v1484_v35  ;;  %v1486_v44 = vrot.slane %v1484_v35, 4  ;;  %v3562_v4 = vrot.slane %v5991_v3, 9  ;;  %v1491_v41 = vrot.slane %v4727_v11, 5  ;;  %v5995_v0 = vld [vmem:[#allocation6_spill] sm:$0xff] }
  0x71   : > { %v1446_v49 = vsel %vm4749_vm7, %v1444_v55, %v1445_v23  ;;  %v1456_v7 = vrot.slane %v5992_v57, 5  ;;  %v1481_v29 = vsel %vm4749_vm7, %v1479_v2, %v1480_v31  ;;  %v1494_v24 = vrot.slane %v4738_v58, 5  ;;  %v5993_v55 = vld [vmem:[#allocation3_spill] sm:$0xff] }
  0x72   : > { %4008 = vmatmul.mubr.msk.bf16.gmra.mxu0 %vm859_vm3, %v4895_v30  ;;  %v4975_v52 = vcombine.low %v1478_v25, %v1481_v29  ;;  %v1488_v61 = vsel %vm4749_vm7, %v1486_v44, %v1487_v27  ;;  %v1492_v11 = vsel %vm4749_vm7, %v3562_v4, %v1491_v41  ;;  %v1493_v38 = vrot.slane %v1491_v41, 4  ;;  %v5996_v27 = vld [vmem:[#allocation9_spill] sm:$0xff]  ;;  %v5069_v4 = vld [vmem:[%s5056_s14] sm:$0xf]  ;;  %v417_v41 = vld [vmem:[%s5056_s14 + $0x8] sm:$0x1] }
  0x73   : > { %4011 = vmatprep.mubr.msk.bf16.mxu0 %vm859_vm3, %v4897_v1  ;;  %v4983_v23 = vcombine.low %v1436_v20, %v1439_v54  ;;  %v3556_v34 = vrot.slane %v5993_v55, 9  ;;  %v4986_v58 = vcombine.low %v1485_v22, %v1488_v61  ;;  %v4988_v8 = vcombine.low %v1443_v48, %v1446_v49  ;;  %v5997_v61 = vld [vmem:[#allocation7_spill] sm:$0xff] }
  0x74   : > { %v1451_v31 = vrot.slane %v1449_v39, 4  ;;  %v1452_v36 = vrot.slane %v5994_v42, 5  ;;  %v1495_v26 = vsel %vm4749_vm7, %v1493_v38, %v1494_v24  ;;  %v3557_v35 = vrot.slane %v5995_v0, 9  ;;  %v5999_v42 = vld [vmem:[#allocation13_spill] sm:$0xff] }
  0x75   : > { %3974 = vmatmul.mubr.msk.bf16.gmra.mxu1 %vm859_vm3, %v4887_v56  ;;  %v1458_v40 = vrot.slane %v1456_v7, 4  ;;  %v1459_v25 = vrot.slane %v5996_v27, 5  ;;  %v4995_v2 = vcombine.low %v1492_v11, %v1495_v26  ;;  %v4999_v20 = vcombine.low %v4698_v51, %v4705_v62  ;;  %v6003_v26 = vld [vmem:[#allocation5_spill] sm:$0xff] }
  0x76   : > { %3977 = vmatprep.mubr.msk.bf16.mxu1 %vm859_vm3, %v4891_v17  ;;  %v5005_v48 = vcombine.low %v4403_v13, %v4408_v16  ;;  %v1450_v54 = vsel %vm4749_vm7, %v3556_v34, %v1449_v39  ;;  %v1453_v3 = vsel %vm4749_vm7, %v1451_v31, %v1452_v36  ;;  %v1457_v51 = vsel %vm4749_vm7, %v3557_v35, %v1456_v7  ;;  %v5998_v34 = vld [vmem:[#allocation11_spill] sm:$0xff]  ;;  %v6002_v36 = vld [vmem:[#allocation24_spill] sm:$0xff] }
  0x77   : > { %v1460_v62 = vsel %vm4749_vm7, %v1458_v40, %v1459_v25  ;;  %v5021_v13 = vcombine.low %v1450_v54, %v1453_v3  ;;  %v5027_v39 = vcombine.low %v5993_v55, %v4448_v59  ;;  %v5033_v22 = vcombine.low %v5995_v0, %v5992_v57  ;;  %v5063_v59 = vld [vmem:[%s5056_s14 + $0x4] sm:$0xf]  ;;  %v3688_v55 = vld [vmem:[%s5908_s2 + $0x10] sm:$0x3] }
  0x78   : > { %v5023_v16 = vcombine.low %v1457_v51, %v1460_v62  ;;  %v2227_v44 = vrot.slane %v5063_v59, 5  ;;  %v3632_v49 = vrot.slane %v5069_v4, 9  ;;  %v2230_v7 = vrot.slane %v417_v41, 5  ;;  %v6004_v0 = vld [vmem:[#allocation10_spill] sm:$0xff]  ;;  %v6005_v35 = vld [vmem:[#allocation12_spill] sm:$0xff] }
  0x79   : > { %v2447_v38 = vsel %vm908_vm0, %v4833_v46, 0  ;;  %v2241_v31 = vsel %vm908_vm0, %v4850_v19, 0  ;;  %v6000_v46 = vld [vmem:[#allocation15_spill] sm:$0xff]  ;;  %v6006_v40 = vld [vmem:[#allocation14_spill] sm:$0xff]  ;;  %v1997_v27 = vshrl.u32 %v5069_v4, 16  ;;  %v2000_v25 = vshll.u32 %v5069_v4, 16 }
  0x7a   : > { %4012 = vmatmul.mubr.msk.bf16.gmra.mxu0 %vm859_vm3, %v4983_v23  ;;  %v2229_v57 = vrot.slane %v2227_v44, 4  ;;  %v2228_v29 = vsel %vm4749_vm7, %v3632_v49, %v2227_v44  ;;  %v6001_v19 = vld [vmem:[#allocation19_spill] sm:$0xff]  ;;  %v2010_v54 = vshrl.u32 %v5063_v59, 16  ;;  %v2006_v3 = vshll.u32 %v5063_v59, 16 }
  0x7b   : > { %4015 = vmatprep.mubr.msk.bf16.mxu0 %vm859_vm3, %v4988_v8  ;;  %v1999_v51 = vrot.slane %v1997_v27, 4  ;;  %v2002_v62 = vrot.slane %v2000_v25, 5 }
  0x7c   : > { %v2231_v24 = vsel %vm4749_vm7, %v2229_v57, %v2230_v7  ;;  %v2008_v44 = vrot.slane %v2006_v3, 5  ;;  %v2012_v49 = vrot.slane %v2010_v54, 4  ;;  %v6007_v57 = vld [vmem:[#allocation17_spill] sm:$0xff]  ;;  %v6008_v7 = vld [vmem:[#allocation22_spill] sm:$0xff]  ;;  %v3597_v3 = vcombine.low %v5069_v4, %v5063_v59 }
  0x7d   : > { %3978 = vmatmul.mubr.msk.bf16.gmra.mxu1 %vm859_vm3, %v4999_v20  ;;  %v5081_v11 = vcombine.low %v2228_v29, %v2231_v24  ;;  %v2003_v29 = vor.u32 %v2002_v62, %v1999_v51  ;;  %v2887_v51 = vsel %vm908_vm0, %v3688_v55, 0 }
  0x7e   : > { %3981 = vmatprep.mubr.msk.bf16.mxu1 %vm859_vm3, %v5005_v48  ;;  %v2013_v24 = vor.u32 %v2012_v49, %v2008_v44 }
  0x82   : > { %4016 = vmatmul.mubr.msk.bf16.gmra.mxu0 %vm859_vm3, %v5021_v13 }
  0x83   : > { %4019 = vmatprep.mubr.msk.bf16.mxu0 %vm859_vm3, %v5023_v16 }
  0x85   : > { %3982 = vmatmul.mubr.msk.bf16.gmra.mxu1 %vm859_vm3, %v5027_v39 }
  0x86   : > { %3985 = vmatprep.mubr.msk.bf16.mxu1 %vm859_vm3, %v5033_v22 }
  0x8a   : > { %4020 = vmatmul.mubr.msk.bf16.gmra.mxu0 %vm859_vm3, %v4938_v21 }
  0x8b   : > { %4023 = vmatprep.mubr.msk.bf16.mxu0 %vm859_vm3, %v4953_v50 }
  0x8d   : > { %3986 = vmatmul.mubr.msk.bf16.gmra.mxu1 %vm859_vm3, %v4902_v18 }
  0x8e   : > { %3989 = vmatprep.mubr.msk.bf16.mxu1 %vm859_vm3, %v4915_v6 }
  0x92   : > { %4024 = vmatmul.mubr.msk.bf16.gmra.mxu0 %vm859_vm3, %v4975_v52 }
  0x93   : > { %4027 = vmatprep.mubr.msk.bf16.mxu0 %vm859_vm3, %v4986_v58 }
  0x95   : > { %3990 = vmatmul.mubr.msk.bf16.gmra.mxu1 %vm859_vm3, %v4929_v43 }
  0x96   : > { %3993 = vmatprep.mubr.msk.bf16.mxu1 %vm859_vm3, %v4944_v28 }
  0x9a   : > { %4028 = vmatmul.mubr.msk.bf16.gmra.mxu0 %vm859_vm3, %v4995_v2 }
  0x9b   : > { %4067 = vmatprep.mubr.msk.bf16.mxu0 %vm859_vm3, %v5997_v61  ;;  %v2016_v61 = vshll.u32 %v417_v41, 16 }
  0x9d   : > { %3994 = vmatmul.mubr.msk.bf16.gmra.mxu1 %vm859_vm3, %v4959_v9  ;;  %v2018_v27 = vrot.slane %v2016_v61, 5  ;;  %v5273_v61 = vld [vmem:[%s5056_s14 + $0x10] sm:$0xf] }
  0x9e   : > { %4033 = vmatprep.mubr.msk.bf16.mxu1 %vm859_vm3, %v4761_v45  ;;  %v3669_v45 = vld [vmem:[%s5908_s2 + $0xe] sm:$0x3] }
  0x9f   : > { %v2675_v62 = vsel %vm908_vm0, %v3669_v45, 0 }
  0xa2   : > { %4068 = vmatmul.mubr.msk.bf16.vlgmr.msra.gmra.mxu0 %vm859_vm3, %v5998_v34 }
  0xa3   : > { %4134 = vmatpush3.bf16.msra.mxu0 %v2447_v38  ;;  %4071 = vmatprep.mubr.msk.bf16.mxu0 %vm859_vm3, %v5999_v42  ;;  %v2004_v38 = vrot.slane %v2003_v29, 4 }
  0xa4   : > { %4246 = vmatprep.subr.msk.bf16.mxu0 %vm908_vm0, %v3688_v55 }
  0xa5   : > { %4034 = vmatmul.mubr.msk.bf16.vlgmr.msra.gmra.mxu1 %vm859_vm3, %v4788_v63  ;;  %v2009_v25 = vsel %vm4426_vm4, %v2004_v38, %v2008_v44 }
  0xa6   : > { %4100 = vmatpush3.bf16.msra.mxu1 %v2241_v31  ;;  %4037 = vmatprep.mubr.msk.bf16.mxu1 %vm859_vm3, %v4879_v53  ;;  %v2014_v31 = vrot.slane %v2013_v24, 4 }
  0xa7   : > { %4245 = vmatprep.subr.msk.bf16.mxu1 %vm908_vm0, %v3669_v45 }
  0xa8   : > { %v2019_v41 = vsel %vm4426_vm4, %v2014_v31, %v2018_v27 }
  0xa9   : > { %v5163_v54 = vcombine.low %v2009_v25, %v2019_v41 }
  0xaa   : > { %4072 = vmatmul.mubr.msk.bf16.gmra.mxu0 %vm859_vm3, %v6000_v46 }
  0xab   : > { %4075 = vmatprep.mubr.msk.bf16.mxu0 %vm859_vm3, %v6001_v19  ;;  %6009 = vst [vmem:[#allocation16_spill] sm:$0xff] %v5163_v54 }
  0xad   : > { %4038 = vmatmul.mubr.msk.bf16.gmra.mxu1 %vm859_vm3, %v4883_v33 }
  0xae   : > { %4041 = vmatprep.mubr.msk.bf16.mxu1 %vm859_vm3, %v4887_v56 }
  0xb2   : > { %4076 = vmatmul.mubr.msk.bf16.gmra.mxu0 %vm859_vm3, %v6002_v36 }
  0xb3   : > { %4079 = vmatprep.mubr.msk.bf16.mxu0 %vm859_vm3, %v4770_v15 }
  0xb5   : > { %4042 = vmatmul.mubr.msk.bf16.gmra.mxu1 %vm859_vm3, %v4891_v17 }
  0xb6   : > { %4045 = vmatprep.mubr.msk.bf16.mxu1 %vm859_vm3, %v4999_v20 }
  0xba   : > { %4080 = vmatmul.mubr.msk.bf16.gmra.mxu0 %vm859_vm3, %v6003_v26 }
  0xbb   : > { %4083 = vmatprep.mubr.msk.bf16.mxu0 %vm859_vm3, %v6004_v0 }
  0xbd   : > { %4046 = vmatmul.mubr.msk.bf16.gmra.mxu1 %vm859_vm3, %v5005_v48 }
  0xbe   : > { %4049 = vmatprep.mubr.msk.bf16.mxu1 %vm859_vm3, %v5027_v39 }
  0xc2   : > { %4084 = vmatmul.mubr.msk.bf16.gmra.mxu0 %vm859_vm3, %v6005_v35 }
  0xc3   : > { %4087 = vmatprep.mubr.msk.bf16.mxu0 %vm859_vm3, %v6006_v40 }
  0xc5   : > { %4050 = vmatmul.mubr.msk.bf16.gmra.mxu1 %vm859_vm3, %v5033_v22 }
  0xc6   : > { %4053 = vmatprep.mubr.msk.bf16.mxu1 %vm859_vm3, %v4902_v18 }
  0xca   : > { %4088 = vmatmul.mubr.msk.bf16.gmra.mxu0 %vm859_vm3, %v6007_v57 }
  0xcb   : > { %4091 = vmatprep.mubr.msk.bf16.mxu0 %vm859_vm3, %v6008_v7 }
  0xcd   : > { %4054 = vmatmul.mubr.msk.bf16.gmra.mxu1 %vm859_vm3, %v4915_v6 }
  0xce   : > { %4057 = vmatprep.mubr.msk.bf16.mxu1 %vm859_vm3, %v4929_v43 }
  0xd2   : > { %4092 = vmatmul.mubr.msk.bf16.gmra.mxu0 %vm859_vm3, %v4744_v5 }
  0xd3   : > { %4095 = vmatprep.mubr.msk.bf16.mxu0 %vm859_vm3, %v4798_v12 }
  0xd5   : > { %4058 = vmatmul.mubr.msk.bf16.gmra.mxu1 %vm859_vm3, %v4944_v28 }
  0xd6   : > { %4061 = vmatprep.mubr.msk.bf16.mxu1 %vm859_vm3, %v4959_v9 }
  0xda   : > { %4096 = vmatmul.mubr.msk.bf16.gmra.mxu0 %vm859_vm3, %v5163_v54 }
  0xdb   : > { %4135 = vmatprep.mubr.msk.bf16.mxu0 %vm859_vm3, %v4788_v63 }
  0xdd   : > { %4062 = vmatmul.mubr.msk.bf16.gmra.mxu1 %vm859_vm3, %v3597_v3 }
  0xde   : > { %4101 = vmatprep.mubr.msk.bf16.mxu1 %vm859_vm3, %v4795_v47 }
  0xe2   : > { %4136 = vmatmul.mubr.msk.bf16.vlgmr.msra.gmra.mxu0 %vm859_vm3, %v4879_v53 }
  0xe3   : > { %4202 = vmatpush3.bf16.msra.mxu0 %v2887_v51  ;;  %4139 = vmatprep.mubr.msk.bf16.mxu0 %vm859_vm3, %v4883_v33 }
  0xe5   : > { %4102 = vmatmul.mubr.msk.bf16.vlgmr.msra.gmra.mxu1 %vm859_vm3, %v4818_v37 }
  0xe6   : > { %4168 = vmatpush3.bf16.msra.mxu1 %v2675_v62  ;;  %4105 = vmatprep.mubr.msk.bf16.mxu1 %vm859_vm3, %v4858_v14  ;;  %v5186_v63 = vpop.f32.mrf.mxu0 }
  0xe8   : > { %v5196_v53 = vpop.f32.mrf.mxu0 }
  0xea   : > { %4140 = vmatmul.mubr.msk.bf16.gmra.mxu0 %vm859_vm3, %v4887_v56  ;;  %v5202_v56 = vpop.f32.mrf.mxu0 }
  0xeb   : > { %4143 = vmatprep.mubr.msk.bf16.mxu0 %vm859_vm3, %v4891_v17  ;;  %v5192_v47 = vpop.f32.mrf.mxu1 }
  0xec   : > { %v5212_v59 = vpop.f32.mrf.mxu0 }
  0xed   : > { %4106 = vmatmul.mubr.msk.bf16.gmra.mxu1 %vm859_vm3, %v4860_v10  ;;  %v5198_v33 = vpop.f32.mrf.mxu1 }
  0xee   : > { %4109 = vmatprep.mubr.msk.bf16.mxu1 %vm859_vm3, %v4895_v30 }
  0xef   : > { %v5208_v17 = vpop.f32.mrf.mxu1 }
  0xf1   : > { %v5214_v4 = vpop.f32.mrf.mxu1 }
  0xf2   : > { %4144 = vmatmul.mubr.msk.bf16.gmra.mxu0 %vm859_vm3, %v4999_v20 }
  0xf3   : > { %4147 = vmatprep.mubr.msk.bf16.mxu0 %vm859_vm3, %v5005_v48 }
  0xf5   : > { %4110 = vmatmul.mubr.msk.bf16.gmra.mxu1 %vm859_vm3, %v4897_v1 }
  0xf6   : > { %4113 = vmatprep.mubr.msk.bf16.mxu1 %vm859_vm3, %v4983_v23 }
  0xf7   : > { %v5218_v20 = vpop.f32.mrf.mxu0 }
  0xf9   : > { %v5228_v55 = vpop.f32.mrf.mxu0 }
  0xfa   : > { %4148 = vmatmul.mubr.msk.bf16.gmra.mxu0 %vm859_vm3, %v5027_v39 }
  0xfb   : > { %4151 = vmatprep.mubr.msk.bf16.mxu0 %vm859_vm3, %v5033_v22  ;;  %v5224_v48 = vpop.f32.mrf.mxu1  ;;  %v5234_v39 = vpop.f32.mrf.mxu0 }
  0xfd   : > { %4114 = vmatmul.mubr.msk.bf16.gmra.mxu1 %vm859_vm3, %v4988_v8  ;;  %v5230_v45 = vpop.f32.mrf.mxu1  ;;  %v5244_v44 = vpop.f32.mrf.mxu0 }
  0xfe   : > { %4117 = vmatprep.mubr.msk.bf16.mxu1 %vm859_vm3, %v5021_v13 }
  0xff   : > { %v5240_v22 = vpop.f32.mrf.mxu1 }
 0x101   : > { %v5246_v49 = vpop.f32.mrf.mxu1 }
 0x102   : > { %4152 = vmatmul.mubr.msk.bf16.gmra.mxu0 %vm859_vm3, %v4902_v18 }
 0x103   : > { %4155 = vmatprep.mubr.msk.bf16.mxu0 %vm859_vm3, %v4915_v6 }
 0x105   : > { %4118 = vmatmul.mubr.msk.bf16.gmra.mxu1 %vm859_vm3, %v5023_v16 }
 0x106   : > { %4121 = vmatprep.mubr.msk.bf16.mxu1 %vm859_vm3, %v4938_v21 }
 0x108   : > { %v5250_v18 = vpop.f32.mrf.mxu0 }
 0x10a   : > { %4156 = vmatmul.mubr.msk.bf16.gmra.mxu0 %vm859_vm3, %v4929_v43  ;;  %v5260_v29 = vpop.f32.mrf.mxu0 }
 0x10b   : > { %4159 = vmatprep.mubr.msk.bf16.mxu0 %vm859_vm3, %v4944_v28  ;;  %v5270_v28 = vld [vmem:[%s5056_s14 + $0xc] sm:$0xf] }
 0x10c   : > { %v5266_v43 = vpop.f32.mrf.mxu0 }
 0x10d   : > { %4122 = vmatmul.mubr.msk.bf16.gmra.mxu1 %vm859_vm3, %v4953_v50  ;;  %v5256_v6 = vpop.f32.mrf.mxu1 }
 0x10e   : > { %6010 = vst [vmem:[#allocation20_spill] sm:$0xff] %v5256_v6  ;;  %4125 = vmatprep.mubr.msk.bf16.mxu1 %vm859_vm3, %v4975_v52  ;;  %v5279_v31 = vpop.f32.mrf.mxu0 }
 0x10f   : > { %v5262_v24 = vpop.f32.mrf.mxu1 }
 0x110   : > { %6011 = vst [vmem:[#allocation18_spill] sm:$0xff] %v5262_v24 }
 0x111   : > { %v5277_v38 = vpop.f32.mrf.mxu1 }
 0x112   : > { %4160 = vmatmul.mubr.msk.bf16.gmra.mxu0 %vm859_vm3, %v4959_v9  ;;  %6012 = vst [vmem:[#allocation21_spill] sm:$0xff] %v5277_v38  ;;  %v3652_v9 = vcombine.low %v5270_v28, %v5273_v61 }
 0x113   : > { %4163 = vmatprep.mubr.msk.bf16.mxu0 %vm859_vm3, %v3597_v3  ;;  %v5285_v27 = vpop.f32.mrf.mxu1 }
 0x114   : > { %6013 = vst [vmem:[#allocation23_spill] sm:$0xff] %v5285_v27 }
 0x115   : > { %4126 = vmatmul.mubr.msk.bf16.gmra.mxu1 %vm859_vm3, %v4986_v58 }
 0x116   : > { %4129 = vmatprep.mubr.msk.bf16.mxu1 %vm859_vm3, %v4995_v2 }
 0x11a   : > { %v5287_v25 = vpop.f32.mrf.mxu0  ;;  %4164 = vmatmul.mubr.msk.bf16.gmra.mxu0 %vm859_vm3, %v3652_v9 }
 0x11b   : > { %4203 = vmatprep.mubr.msk.bf16.mxu0 %vm859_vm3, %v4818_v37 }
 0x11c   : > { %v5292_v41 = vpop.f32.mrf.mxu0 }
 0x11d   : > { %v5294_v3 = vpop.f32.mrf.mxu1  ;;  %4130 = vmatmul.mubr.msk.bf16.gmra.mxu1 %vm859_vm3, %v5081_v11 }
 0x11e   : > { %6014 = vst [vmem:[#allocation8_spill] sm:$0xff] %v5294_v3  ;;  %v5298_v51 = vpop.f32.mrf.mxu0  ;;  %4169 = vmatprep.mubr.msk.bf16.mxu1 %vm859_vm3, %v5998_v34 }
 0x11f   : > { %v5302_v62 = vpop.f32.mrf.mxu1 }
 0x120   : > { %6015 = vst [vmem:[#allocation3_spill] sm:$0xff] %v5302_v62  ;;  %v5304_v27 = vpop.f32.mrf.mxu0 }
 0x121   : > { %v5306_v9 = vpop.f32.mrf.mxu1 }
 0x122   : > { %6016 = vst [vmem:[#allocation4_spill] sm:$0xff] %v5306_v9  ;;  %v4001_v38 = vpop.f32.mrf.mxu0  ;;  %4204 = vmatmul.mubr.msk.bf16.vlgmr.msra.gmra.mxu0 %vm859_vm3, %v4858_v14 }
 0x123   : > { %v5310_v37 = vpop.f32.mrf.mxu1  ;;  %4207 = vmatprep.mubr.msk.bf16.mxu0 %vm859_vm3, %v4860_v10 }
 0x124   : > { %6017 = vst [vmem:[#allocation6_spill] sm:$0xff] %v5310_v37  ;;  %v1631_v3 = vpop.f32.mrf.mxu0 }
 0x125   : > { %v3967_v24 = vpop.f32.mrf.mxu1  ;;  %4170 = vmatmul.mubr.msk.bf16.vlgmr.msra.gmra.mxu1 %vm859_vm3, %v5999_v42 }
 0x126   : > { %v1247_v34 = vadd.f32 %v3967_v24, %v5186_v63  ;;  %v4002_v62 = vpop.f32.mrf.mxu0  ;;  %4173 = vmatprep.mubr.msk.bf16.mxu1 %vm859_vm3, %v6000_v46 }
 0x127   : > { %v1238_v9 = vpop.f32.mrf.mxu1 }
 0x128   : > { %v5319_v54 = vadd.f32 %v4001_v38, %v1247_v34  ;;  %v1239_v14 = vadd.f32 %v1238_v9, %v5196_v53  ;;  %v1634_v37 = vpop.f32.mrf.mxu0 }
 0x129   : > { %v3968_v6 = vpop.f32.mrf.mxu1 }
 0x12a   : > { %v5322_v32 = vadd.f32 %v1631_v3, %v1239_v14  ;;  %v1250_v10 = vadd.f32 %v3968_v6, %v5202_v56  ;;  %v4005_v12 = vpop.f32.mrf.mxu0  ;;  %4208 = vmatmul.mubr.msk.bf16.gmra.mxu0 %vm859_vm3, %v4895_v30 }
 0x12b   : > { %v1241_v42 = vpop.f32.mrf.mxu1  ;;  %4211 = vmatprep.mubr.msk.bf16.mxu0 %vm859_vm3, %v4897_v1 }
 0x12c   : > { %v5329_v46 = vadd.f32 %v4002_v62, %v1250_v10  ;;  %v1242_v63 = vadd.f32 %v1241_v42, %v5212_v59  ;;  %v1647_v24 = vpop.f32.mrf.mxu0 }
 0x12d   : > { %v3971_v53 = vpop.f32.mrf.mxu1  ;;  %4174 = vmatmul.mubr.msk.bf16.gmra.mxu1 %vm859_vm3, %v6001_v19 }
 0x12e   : > { %v5334_v38 = vadd.f32 %v1634_v37, %v1242_v63  ;;  %v1263_v56 = vadd.f32 %v3971_v53, %v5218_v20  ;;  %v4006_v6 = vpop.f32.mrf.mxu0  ;;  %4177 = vmatprep.mubr.msk.bf16.mxu1 %vm859_vm3, %v6002_v36 }
 0x12f   : > { %v1254_v30 = vpop.f32.mrf.mxu1 }
 0x130   : > { %v5339_v3 = vadd.f32 %v4005_v12, %v1263_v56  ;;  %v1255_v1 = vadd.f32 %v1254_v30, %v5228_v55  ;;  %v1650_v62 = vpop.f32.mrf.mxu0 }
 0x131   : > { %v3972_v59 = vpop.f32.mrf.mxu1 }
 0x132   : > { %v5342_v9 = vadd.f32 %v1647_v24, %v1255_v1  ;;  %v1266_v34 = vadd.f32 %v3972_v59, %v5234_v39  ;;  %v4009_v19 = vpop.f32.mrf.mxu0  ;;  %4212 = vmatmul.mubr.msk.bf16.gmra.mxu0 %vm859_vm3, %v4983_v23 }
 0x133   : > { %v1257_v20 = vpop.f32.mrf.mxu1  ;;  %4215 = vmatprep.mubr.msk.bf16.mxu0 %vm859_vm3, %v4988_v8 }
 0x134   : > { %v5349_v36 = vadd.f32 %v4006_v6, %v1266_v34  ;;  %v1258_v12 = vadd.f32 %v1257_v20, %v5244_v44  ;;  %v1663_v37 = vpop.f32.mrf.mxu0 }
 0x135   : > { %v3975_v55 = vpop.f32.mrf.mxu1  ;;  %4178 = vmatmul.mubr.msk.bf16.gmra.mxu1 %vm859_vm3, %v4770_v15 }
 0x136   : > { %v5354_v14 = vadd.f32 %v1650_v62, %v1258_v12  ;;  %v1279_v39 = vadd.f32 %v3975_v55, %v5250_v18  ;;  %v4010_v10 = vpop.f32.mrf.mxu0  ;;  %4181 = vmatprep.mubr.msk.bf16.mxu1 %vm859_vm3, %v6003_v26 }
 0x137   : > { %v1270_v23 = vpop.f32.mrf.mxu1 }
 0x138   : > { %v5359_v42 = vadd.f32 %v4009_v19, %v1279_v39  ;;  %v1271_v8 = vadd.f32 %v1270_v23, %v5260_v29  ;;  %v1666_v63 = vpop.f32.mrf.mxu0 }
 0x139   : > { %v3976_v44 = vpop.f32.mrf.mxu1 }
 0x13a   : > { %v5362_v24 = vadd.f32 %v1663_v37, %v1271_v8  ;;  %v1282_v53 = vadd.f32 %v3976_v44, %v5266_v43  ;;  %v4013_v15 = vpop.f32.mrf.mxu0  ;;  %4216 = vmatmul.mubr.msk.bf16.gmra.mxu0 %vm859_vm3, %v5021_v13  ;;  %v2646_v37 = vshll.u32 %v5270_v28, 16 }
 0x13b   : > { %v1273_v18 = vpop.f32.mrf.mxu1  ;;  %4219 = vmatprep.mubr.msk.bf16.mxu0 %vm859_vm3, %v5023_v16 }
 0x13c   : > { %v5369_v26 = vadd.f32 %v4010_v10, %v1282_v53  ;;  %v1274_v56 = vadd.f32 %v1273_v18, %v5279_v31  ;;  %v1679_v6 = vpop.f32.mrf.mxu0  ;;  %v2648_v44 = vrot.slane %v2646_v37, 5 }
 0x13d   : > { %v3979_v29 = vpop.f32.mrf.mxu1  ;;  %4182 = vmatmul.mubr.msk.bf16.gmra.mxu1 %vm859_vm3, %v6004_v0 }
 0x13e   : > { %v5374_v30 = vadd.f32 %v1666_v63, %v1274_v56  ;;  %v1295_v43 = vadd.f32 %v3979_v29, %v5287_v25  ;;  %v4014_v1 = vpop.f32.mrf.mxu0  ;;  %4185 = vmatprep.mubr.msk.bf16.mxu1 %vm859_vm3, %v6005_v35 }
 0x13f   : > { %v1286_v13 = vpop.f32.mrf.mxu1 }
 0x140   : > { %v5379_v62 = vadd.f32 %v4013_v15, %v1295_v43  ;;  %v1287_v16 = vadd.f32 %v1286_v13, %v5292_v41  ;;  %v1682_v59 = vpop.f32.mrf.mxu0  ;;  %v2643_v41 = vshrl.u32 %v5270_v28, 16 }
 0x141   : > { %v3980_v31 = vpop.f32.mrf.mxu1 }
 0x142   : > { %v5382_v34 = vadd.f32 %v1679_v6, %v1287_v16  ;;  %v1298_v19 = vadd.f32 %v3980_v31, %v5298_v51  ;;  %v4017_v0 = vpop.f32.mrf.mxu0  ;;  %4220 = vmatmul.mubr.msk.bf16.gmra.mxu0 %vm859_vm3, %v4938_v21  ;;  %v2652_v51 = vshll.u32 %v5273_v61, 16  ;;  %v2656_v21 = vshrl.u32 %v5273_v61, 16 }
 0x143   : > { %v1289_v25 = vpop.f32.mrf.mxu1  ;;  %4223 = vmatprep.mubr.msk.bf16.mxu0 %vm859_vm3, %v4953_v50 }
 0x144   : > { %v5389_v35 = vadd.f32 %v4014_v1, %v1298_v19  ;;  %v1290_v20 = vadd.f32 %v1289_v25, %v5304_v27  ;;  %v1695_v12 = vpop.f32.mrf.mxu0  ;;  %v2654_v15 = vrot.slane %v2652_v51, 5  ;;  %v2658_v18 = vrot.slane %v2656_v21, 4 }
 0x145   : > { %v3983_v55 = vpop.f32.mrf.mxu1  ;;  %4186 = vmatmul.mubr.msk.bf16.gmra.mxu1 %vm859_vm3, %v6006_v40  ;;  %v2645_v40 = vrot.slane %v2643_v41, 4  ;;  %v3687_v19 = vrot.slane %v5270_v28, 9 }
 0x146   : > { %v5398_v39 = vadd.f32 %v1682_v59, %v1290_v20  ;;  %v1311_v50 = vadd.f32 %v3983_v55, %v5192_v47  ;;  %v4018_v10 = vpop.f32.mrf.mxu0  ;;  %4189 = vmatprep.mubr.msk.bf16.mxu1 %vm859_vm3, %v6007_v57  ;;  %v2873_v57 = vrot.slane %v5273_v61, 5 }
 0x147   : > { %v1302_v27 = vpop.f32.mrf.mxu1 }
 0x148   : > { %v5403_v23 = vadd.f32 %v4017_v0, %v1311_v50  ;;  %v1303_v8 = vadd.f32 %v1302_v27, %v5198_v33  ;;  %v1698_v63 = vpop.f32.mrf.mxu0  ;;  %v420_v33 = vld [vmem:[%s5056_s14 + $0x14] sm:$0x1] }
 0x149   : > { %v3984_v53 = vpop.f32.mrf.mxu1  ;;  %v2662_v31 = vshll.u32 %v420_v33, 16  ;;  %v2876_v25 = vrot.slane %v420_v33, 5 }
 0x14a   : > { %v5406_v56 = vadd.f32 %v1695_v12, %v1303_v8  ;;  %v1314_v47 = vadd.f32 %v3984_v53, %v5208_v17  ;;  %v4021_v6 = vpop.f32.mrf.mxu0  ;;  %4224 = vmatmul.mubr.msk.bf16.gmra.mxu0 %vm859_vm3, %v4975_v52  ;;  %v2649_v17 = vor.u32 %v2648_v44, %v2645_v40 }
 0x14b   : > { %v1305_v29 = vpop.f32.mrf.mxu1  ;;  %4227 = vmatprep.mubr.msk.bf16.mxu0 %vm859_vm3, %v4986_v58  ;;  %v2659_v58 = vor.u32 %v2658_v18, %v2654_v15  ;;  %v2664_v28 = vrot.slane %v2662_v31, 5 }
 0x14c   : > { %v5415_v43 = vadd.f32 %v4018_v10, %v1314_v47  ;;  %v1306_v1 = vadd.f32 %v1305_v29, %v5214_v4  ;;  %v1711_v13 = vpop.f32.mrf.mxu0  ;;  %v2875_v4 = vrot.slane %v2873_v57, 4  ;;  %v2650_v37 = vrot.slane %v2649_v17, 4  ;;  %v6021_v47 = vld [vmem:[#allocation16_spill] sm:$0xff]  ;;  %v6022_v29 = vld [vmem:[#allocation18_spill] sm:$0xff]  ;;  %v6023_v17 = vld [vmem:[#allocation21_spill] sm:$0xff] }
 0x14d   : > { %v3987_v16 = vpop.f32.mrf.mxu1  ;;  %4190 = vmatmul.mubr.msk.bf16.gmra.mxu1 %vm859_vm3, %v6008_v7 }
 0x14e   : > { %v5420_v59 = vadd.f32 %v1698_v63, %v1306_v1  ;;  %v1327_v52 = vadd.f32 %v3987_v16, %v5224_v48  ;;  %v4022_v61 = vpop.f32.mrf.mxu0  ;;  %4193 = vmatprep.mubr.msk.bf16.mxu1 %vm859_vm3, %v4744_v5  ;;  %v2660_v5 = vrot.slane %v2659_v58, 4  ;;  %v2877_v50 = vsel %vm4749_vm7, %v2875_v4, %v2876_v25  ;;  %v6018_v63 = vld [vmem:[#allocation25_spill] sm:$0xff] }
 0x14f   : > { %v1318_v0 = vpop.f32.mrf.mxu1  ;;  %v2655_v40 = vsel %vm4426_vm4, %v2650_v37, %v2654_v15 }
 0x150   : > { %v5426_v20 = vadd.f32 %v4021_v6, %v1327_v52  ;;  %v1319_v7 = vadd.f32 %v1318_v0, %v5230_v45  ;;  %v1714_v12 = vpop.f32.mrf.mxu0  ;;  %v2874_v45 = vsel %vm4749_vm7, %v3687_v19, %v2873_v57  ;;  %v2665_v60 = vsel %vm4426_vm4, %v2660_v5, %v2664_v28  ;;  %v6024_v19 = vld [vmem:[#allocation23_spill] sm:$0xff] }
 0x151   : > { %v3988_v41 = vpop.f32.mrf.mxu1  ;;  %v3670_v15 = vcombine.low %v2655_v40, %v2665_v60  ;;  %v6026_v5 = vld [vmem:[#allocation3_spill] sm:$0xff]  ;;  %v6028_v40 = vld [vmem:[#allocation6_spill] sm:$0xff] }
 0x152   : > { %v5429_v55 = vadd.f32 %v1711_v13, %v1319_v7  ;;  %v1330_v48 = vadd.f32 %v3988_v41, %v5240_v22  ;;  %v4025_v51 = vpop.f32.mrf.mxu0  ;;  %4228 = vmatmul.mubr.msk.bf16.gmra.mxu0 %vm859_vm3, %v4995_v2 }
 0x153   : > { %v1321_v21 = vpop.f32.mrf.mxu1  ;;  %4231 = vmatprep.mubr.msk.bf16.mxu0 %vm859_vm3, %v5081_v11  ;;  %v6020_v11 = vld [vmem:[#allocation20_spill] sm:$0xff] }
 0x154   : > { %v5440_v10 = vadd.f32 %v4022_v61, %v1330_v48  ;;  %v1322_v22 = vadd.f32 %v1321_v21, %v5246_v49  ;;  %v1727_v27 = vpop.f32.mrf.mxu0  ;;  %v3689_v49 = vcombine.low %v2874_v45, %v2877_v50 }
 0x155   : > { %v3991_v8 = vpop.f32.mrf.mxu1  ;;  %4194 = vmatmul.mubr.msk.bf16.gmra.mxu1 %vm859_vm3, %v6018_v63 }
 0x156   : > { %v5447_v44 = vadd.f32 %v1714_v12, %v1322_v22  ;;  %v1343_v53 = vadd.f32 %v3991_v8, %v6020_v11  ;;  %v4026_v18 = vpop.f32.mrf.mxu0  ;;  %4197 = vmatprep.mubr.msk.bf16.mxu1 %vm859_vm3, %v6021_v47  ;;  %v6025_v12 = vld [vmem:[#allocation8_spill] sm:$0xff] }
 0x157   : > { %v1334_v6 = vpop.f32.mrf.mxu1  ;;  %v6027_v22 = vld [vmem:[#allocation4_spill] sm:$0xff] }
 0x158   : > { %v5454_v57 = vadd.f32 %v4025_v51, %v1343_v53  ;;  %v1335_v33 = vadd.f32 %v1334_v6, %v6022_v29  ;;  %v1730_v1 = vpop.f32.mrf.mxu0 }
 0x159   : > { %v3992_v13 = vpop.f32.mrf.mxu1 }
 0x15a   : > { %v5457_v16 = vadd.f32 %v1727_v27, %v1335_v33  ;;  %v1346_v52 = vadd.f32 %v3992_v13, %v6023_v17  ;;  %v4029_v61 = vpop.f32.mrf.mxu0  ;;  %4232 = vmatmul.mubr.msk.bf16.gmra.mxu0 %vm859_vm3, %v3689_v49 }
 0x15b   : > { %v1337_v58 = vpop.f32.mrf.mxu1 }
 0x15c   : > { %v5461_v31 = vadd.f32 %v4026_v18, %v1346_v52  ;;  %v1338_v0 = vadd.f32 %v1337_v58, %v6024_v19  ;;  %v1743_v4 = vpop.f32.mrf.mxu0 }
 0x15d   : > { %v3995_v25 = vpop.f32.mrf.mxu1  ;;  %4198 = vmatmul.mubr.msk.bf16.gmra.mxu1 %vm859_vm3, %v3670_v15 }
 0x15e   : > { %v5465_v7 = vadd.f32 %v1730_v1, %v1338_v0  ;;  %v1359_v41 = vadd.f32 %v3995_v25, %v6025_v12  ;;  %v4030_v37 = vpop.f32.mrf.mxu0 }
 0x15f   : > { %v1350_v48 = vpop.f32.mrf.mxu1 }
 0x160   : > { %v5468_v51 = vadd.f32 %v4029_v61, %v1359_v41  ;;  %v1351_v28 = vadd.f32 %v1350_v48, %v6026_v5  ;;  %v1746_v21 = vpop.f32.mrf.mxu0 }
 0x161   : > { %v3996_v45 = vpop.f32.mrf.mxu1 }
 0x162   : > { %v5471_v50 = vadd.f32 %v1743_v4, %v1351_v28  ;;  %v1362_v27 = vadd.f32 %v3996_v45, %v6027_v22  ;;  %v4069_v8 = vpop.f32.mrf.mxu0 }
 0x163   : > { %v1353_v63 = vpop.f32.mrf.mxu1 }
 0x164   : > { %v5474_v2 = vadd.f32 %v4030_v37, %v1362_v27  ;;  %v1354_v11 = vadd.f32 %v1353_v63, %v6028_v40  ;;  %v2065_v53 = vpop.f32.mrf.mxu0 }
 0x165   : > { %v4035_v18 = vpop.f32.mrf.mxu1 }
 0x166   : > { %v5477_v47 = vadd.f32 %v1746_v21, %v1354_v11  ;;  %v1966_v60 = vadd.f32 %v4035_v18, %v5319_v54  ;;  %v4070_v49 = vpop.f32.mrf.mxu0 }
 0x167   : > { %v1837_v6 = vpop.f32.mrf.mxu1 }
 0x168   : > { %v5480_v29 = vadd.f32 %v4069_v8, %v1966_v60  ;;  %v1964_v33 = vadd.f32 %v1837_v6, %v5322_v32  ;;  %v2068_v1 = vpop.f32.mrf.mxu0 }
 0x169   : > { %v4036_v13 = vpop.f32.mrf.mxu1 }
 0x16a   : > { %v5483_v15 = vadd.f32 %v2065_v53, %v1964_v33  ;;  %v1967_v17 = vadd.f32 %v4036_v13, %v5329_v46  ;;  %v4073_v52 = vpop.f32.mrf.mxu0 }
 0x16b   : > { %v1840_v61 = vpop.f32.mrf.mxu1 }
 0x16c   : > { %v5486_v58 = vadd.f32 %v4070_v49, %v1967_v17  ;;  %v1965_v19 = vadd.f32 %v1840_v61, %v5334_v38  ;;  %v2081_v0 = vpop.f32.mrf.mxu0 }
 0x16d   : > { %v4039_v54 = vpop.f32.mrf.mxu1 }
 0x16e   : > { %v5489_v4 = vadd.f32 %v2068_v1, %v1965_v19  ;;  %v1970_v25 = vadd.f32 %v4039_v54, %v5339_v3  ;;  %v4074_v12 = vpop.f32.mrf.mxu0 }
 0x16f   : > { %v1853_v32 = vpop.f32.mrf.mxu1 }
 0x170   : > { %v5492_v41 = vadd.f32 %v4073_v52, %v1970_v25  ;;  %v1968_v37 = vadd.f32 %v1853_v32, %v5342_v9  ;;  %v2084_v48 = vpop.f32.mrf.mxu0 }
 0x171   : > { %v4040_v46 = vpop.f32.mrf.mxu1 }
 0x172   : > { %v5495_v5 = vadd.f32 %v2081_v0, %v1968_v37  ;;  %v1971_v28 = vadd.f32 %v4040_v46, %v5349_v36  ;;  %v4077_v21 = vpop.f32.mrf.mxu0 }
 0x173   : > { %v1856_v38 = vpop.f32.mrf.mxu1 }
 0x174   : > { %v5498_v45 = vadd.f32 %v4074_v12, %v1971_v28  ;;  %v1969_v22 = vadd.f32 %v1856_v38, %v5354_v14  ;;  %v2097_v27 = vpop.f32.mrf.mxu0 }
 0x175   : > { %v4043_v3 = vpop.f32.mrf.mxu1 }
 0x176   : > { %v5501_v8 = vadd.f32 %v2084_v48, %v1969_v22  ;;  %v1974_v63 = vadd.f32 %v4043_v3, %v5359_v42  ;;  %v4078_v40 = vpop.f32.mrf.mxu0 }
 0x177   : > { %v1869_v9 = vpop.f32.mrf.mxu1 }
 0x178   : > { %v5504_v11 = vadd.f32 %v4077_v21, %v1974_v63  ;;  %v1972_v53 = vadd.f32 %v1869_v9, %v5362_v24  ;;  %v2100_v18 = vpop.f32.mrf.mxu0 }
 0x179   : > { %v4044_v36 = vpop.f32.mrf.mxu1 }
 0x17a   : > { %v5507_v60 = vadd.f32 %v2097_v27, %v1972_v53  ;;  %v1975_v49 = vadd.f32 %v4044_v36, %v5369_v26  ;;  %v4081_v6 = vpop.f32.mrf.mxu0 }
 0x17b   : > { %v1872_v14 = vpop.f32.mrf.mxu1 }
 0x17c   : > { %v5510_v33 = vadd.f32 %v4078_v40, %v1975_v49  ;;  %v1973_v1 = vadd.f32 %v1872_v14, %v5374_v30  ;;  %v2113_v13 = vpop.f32.mrf.mxu0 }
 0x17d   : > { %v4047_v42 = vpop.f32.mrf.mxu1 }
 0x17e   : > { %v5513_v17 = vadd.f32 %v2100_v18, %v1973_v1  ;;  %v1978_v52 = vadd.f32 %v4047_v42, %v5379_v62  ;;  %v4082_v61 = vpop.f32.mrf.mxu0 }
 0x17f   : > { %v1885_v24 = vpop.f32.mrf.mxu1 }
 0x180   : > { %v5516_v19 = vadd.f32 %v4081_v6, %v1978_v52  ;;  %v1976_v0 = vadd.f32 %v1885_v24, %v5382_v34  ;;  %v2116_v54 = vpop.f32.mrf.mxu0 }
 0x181   : > { %v4048_v26 = vpop.f32.mrf.mxu1 }
 0x182   : > { %v5519_v25 = vadd.f32 %v2113_v13, %v1976_v0  ;;  %v1979_v12 = vadd.f32 %v4048_v26, %v5389_v35  ;;  %v4085_v32 = vpop.f32.mrf.mxu0 }
 0x183   : > { %v1888_v30 = vpop.f32.mrf.mxu1 }
 0x184   : > { %v5522_v37 = vadd.f32 %v4082_v61, %v1979_v12  ;;  %v1977_v48 = vadd.f32 %v1888_v30, %v5398_v39  ;;  %v2129_v46 = vpop.f32.mrf.mxu0 }
 0x185   : > { %v4051_v62 = vpop.f32.mrf.mxu1 }
 0x186   : > { %v5525_v28 = vadd.f32 %v2116_v54, %v1977_v48  ;;  %v1982_v21 = vadd.f32 %v4051_v62, %v5403_v23  ;;  %v4086_v38 = vpop.f32.mrf.mxu0 }
 0x187   : > { %v1901_v34 = vpop.f32.mrf.mxu1 }
 0x188   : > { %v5528_v22 = vadd.f32 %v4085_v32, %v1982_v21  ;;  %v1980_v27 = vadd.f32 %v1901_v34, %v5406_v56  ;;  %v2132_v3 = vpop.f32.mrf.mxu0 }
 0x189   : > { %v4052_v35 = vpop.f32.mrf.mxu1 }
 0x18a   : > { %v5531_v63 = vadd.f32 %v2129_v46, %v1980_v27  ;;  %v1983_v40 = vadd.f32 %v4052_v35, %v5415_v43  ;;  %v4089_v9 = vpop.f32.mrf.mxu0 }
 0x18b   : > { %v1904_v39 = vpop.f32.mrf.mxu1 }
 0x18c   : > { %v5534_v53 = vadd.f32 %v4086_v38, %v1983_v40  ;;  %v1981_v18 = vadd.f32 %v1904_v39, %v5420_v59  ;;  %v2145_v36 = vpop.f32.mrf.mxu0 }
 0x18d   : > { %v4055_v23 = vpop.f32.mrf.mxu1 }
 0x18e   : > { %6029 = vst [vmem:[#allocation9_spill] sm:$0xff] %v5534_v53  ;;  %v5537_v49 = vadd.f32 %v2132_v3, %v1981_v18  ;;  %v1986_v6 = vadd.f32 %v4055_v23, %v5426_v20  ;;  %v4090_v14 = vpop.f32.mrf.mxu0 }
 0x18f   : > { %v1917_v56 = vpop.f32.mrf.mxu1 }
 0x190   : > { %6030 = vst [vmem:[#allocation7_spill] sm:$0xff] %v5537_v49  ;;  %v5540_v1 = vadd.f32 %v4089_v9, %v1986_v6  ;;  %v1984_v13 = vadd.f32 %v1917_v56, %v5429_v55  ;;  %v2148_v42 = vpop.f32.mrf.mxu0 }
 0x191   : > { %v4056_v43 = vpop.f32.mrf.mxu1 }
 0x192   : > { %6031 = vst [vmem:[#allocation11_spill] sm:$0xff] %v5540_v1  ;;  %v5543_v52 = vadd.f32 %v2145_v36, %v1984_v13  ;;  %v1987_v61 = vadd.f32 %v4056_v43, %v5440_v10  ;;  %v4093_v24 = vpop.f32.mrf.mxu0 }
 0x193   : > { %v1920_v59 = vpop.f32.mrf.mxu1 }
 0x194   : > { %6032 = vst [vmem:[#allocation13_spill] sm:$0xff] %v5543_v52  ;;  %v5546_v0 = vadd.f32 %v4090_v14, %v1987_v61  ;;  %v1985_v54 = vadd.f32 %v1920_v59, %v5447_v44  ;;  %v2161_v26 = vpop.f32.mrf.mxu0 }
 0x195   : > { %v4059_v20 = vpop.f32.mrf.mxu1 }
 0x196   : > { %6033 = vst [vmem:[#allocation15_spill] sm:$0xff] %v5546_v0  ;;  %v5549_v12 = vadd.f32 %v2148_v42, %v1985_v54  ;;  %v1990_v32 = vadd.f32 %v4059_v20, %v5454_v57  ;;  %v4094_v30 = vpop.f32.mrf.mxu0 }
 0x197   : > { %v1933_v55 = vpop.f32.mrf.mxu1 }
 0x198   : > { %6034 = vst [vmem:[#allocation19_spill] sm:$0xff] %v5549_v12  ;;  %v5552_v48 = vadd.f32 %v4093_v24, %v1990_v32  ;;  %v1988_v46 = vadd.f32 %v1933_v55, %v5457_v16  ;;  %v2164_v62 = vpop.f32.mrf.mxu0 }
 0x199   : > { %v4060_v10 = vpop.f32.mrf.mxu1 }
 0x19a   : > { %6035 = vst [vmem:[#allocation24_spill] sm:$0xff] %v5552_v48  ;;  %v5555_v21 = vadd.f32 %v2161_v26, %v1988_v46  ;;  %v1991_v38 = vadd.f32 %v4060_v10, %v5461_v31  ;;  %v4097_v34 = vpop.f32.mrf.mxu0 }
 0x19b   : > { %v1936_v44 = vpop.f32.mrf.mxu1 }
 0x19c   : > { %6036 = vst [vmem:[#allocation5_spill] sm:$0xff] %v5555_v21  ;;  %v5558_v27 = vadd.f32 %v4094_v30, %v1991_v38  ;;  %v1989_v3 = vadd.f32 %v1936_v44, %v5465_v7  ;;  %v2177_v35 = vpop.f32.mrf.mxu0 }
 0x19d   : > { %v4063_v57 = vpop.f32.mrf.mxu1 }
 0x19e   : > { %6037 = vst [vmem:[#allocation10_spill] sm:$0xff] %v5558_v27  ;;  %v5561_v40 = vadd.f32 %v2164_v62, %v1989_v3  ;;  %v1994_v9 = vadd.f32 %v4063_v57, %v5468_v51  ;;  %v4098_v39 = vpop.f32.mrf.mxu0 }
 0x19f   : > { %v1949_v16 = vpop.f32.mrf.mxu1 }
 0x1a0   : > { %6038 = vst [vmem:[#allocation12_spill] sm:$0xff] %v5561_v40  ;;  %v5564_v18 = vadd.f32 %v4097_v34, %v1994_v9  ;;  %v1992_v36 = vadd.f32 %v1949_v16, %v5471_v50  ;;  %v2180_v23 = vpop.f32.mrf.mxu0 }
 0x1a1   : > { %v4064_v31 = vpop.f32.mrf.mxu1 }
 0x1a2   : > { %6039 = vst [vmem:[#allocation14_spill] sm:$0xff] %v5564_v18  ;;  %v5567_v6 = vadd.f32 %v2177_v35, %v1992_v36  ;;  %v1995_v14 = vadd.f32 %v4064_v31, %v5474_v2  ;;  %v5570_v56 = vpop.f32.mrf.mxu0 }
 0x1a3   : > { %v1952_v7 = vpop.f32.mrf.mxu1 }
 0x1a4   : > { %6040 = vst [vmem:[#allocation17_spill] sm:$0xff] %v5567_v6  ;;  %v5572_v13 = vadd.f32 %v4098_v39, %v1995_v14  ;;  %v1993_v42 = vadd.f32 %v1952_v7, %v5477_v47  ;;  %v5575_v51 = vpop.f32.mrf.mxu0 }
 0x1a5   : > { %v4103_v43 = vpop.f32.mrf.mxu1 }
 0x1a6   : > { %6041 = vst [vmem:[#allocation22_spill] sm:$0xff] %v5572_v13  ;;  %v5577_v61 = vadd.f32 %v2180_v23, %v1993_v42  ;;  %v5579_v24 = vpop.f32.mrf.mxu0 }
 0x1a7   : > { %v2277_v50 = vpop.f32.mrf.mxu1 }
 0x1a8   : > { %6042 = vst [vmem:[#allocation25_spill] sm:$0xff] %v5577_v61  ;;  %v5581_v59 = vpop.f32.mrf.mxu0 }
 0x1a9   : > { %v4104_v54 = vpop.f32.mrf.mxu1 }
 0x1aa   : > { %v5583_v26 = vpop.f32.mrf.mxu0 }
 0x1ab   : > { %v5585_v2 = vpop.f32.mrf.mxu1 }
 0x1ac   : > { %v5587_v20 = vpop.f32.mrf.mxu0 }
 0x1ad   : > { %v5589_v32 = vpop.f32.mrf.mxu1 }
 0x1ae   : > { %v5591_v47 = vpop.f32.mrf.mxu0 }
 0x1af   : > { %v5593_v30 = vpop.f32.mrf.mxu1 }
 0x1b0   : > { %v5595_v55 = vpop.f32.mrf.mxu0 }
 0x1b1   : > { %v5597_v46 = vpop.f32.mrf.mxu1 }
 0x1b2   : > { %v5599_v62 = vpop.f32.mrf.mxu0 }
 0x1b3   : > { %v5601_v10 = vpop.f32.mrf.mxu1 }
 0x1b4   : > { %v5603_v38 = vpop.f32.mrf.mxu0 }
 0x1b5   : > { %v5605_v34 = vpop.f32.mrf.mxu1 }
 0x1b6   : > { %v5607_v44 = vpop.f32.mrf.mxu0 }
 0x1b7   : > { %v5609_v3 = vpop.f32.mrf.mxu1 }
 0x1b8   : > { %v5611_v35 = vpop.f32.mrf.mxu0 }
 0x1b9   : > { %v5613_v57 = vpop.f32.mrf.mxu1 }
 0x1ba   : > { %v5615_v9 = vpop.f32.mrf.mxu0 }
 0x1bb   : > { %v5617_v39 = vpop.f32.mrf.mxu1 }
 0x1bc   : > { %v5619_v16 = vpop.f32.mrf.mxu0 }
 0x1bd   : > { %v5621_v36 = vpop.f32.mrf.mxu1 }
 0x1be   : > { %v5623_v23 = vpop.f32.mrf.mxu0 }
 0x1bf   : > { %v5625_v31 = vpop.f32.mrf.mxu1 }
 0x1c0   : > { %v5627_v14 = vpop.f32.mrf.mxu0 }
 0x1c1   : > { %v5629_v7 = vpop.f32.mrf.mxu1 }
 0x1c2   : > { %v5631_v42 = vpop.f32.mrf.mxu0 }
 0x1c3   : > { %v5633_v61 = vpop.f32.mrf.mxu1 }
 0x1c4   : > { %v5635_v13 = vpop.f32.mrf.mxu0 }
 0x1c5   : > { %6043 = vst [vmem:[#allocation2_spill] sm:$0xff] %v5635_v13  ;;  %v5637_v6 = vpop.f32.mrf.mxu1 }
 0x1c6   : > { %v5639_v18 = vpop.f32.mrf.mxu0 }
 0x1c7   : > { %6044 = vst [vmem:[#allocation20_spill] sm:$0xff] %v5639_v18  ;;  %v5641_v40 = vpop.f32.mrf.mxu1 }
 0x1c8   : > { %v5643_v27 = vpop.f32.mrf.mxu0 }
 0x1c9   : > { %6045 = vst [vmem:[#allocation16_spill] sm:$0xff] %v5643_v27  ;;  %v5645_v21 = vpop.f32.mrf.mxu1 }
 0x1ca   : > { %6046 = vst [vmem:[#allocation18_spill] sm:$0xff] %v5645_v21  ;;  %v5647_v48 = vpop.f32.mrf.mxu0 }
 0x1cb   : > { %6047 = vst [vmem:[#allocation21_spill] sm:$0xff] %v5647_v48  ;;  %v5649_v12 = vpop.f32.mrf.mxu1 }
 0x1cc   : > { %6048 = vst [vmem:[#allocation23_spill] sm:$0xff] %v5649_v12  ;;  %v5651_v0 = vpop.f32.mrf.mxu0 }
 0x1cd   : > { %6049 = vst [vmem:[#allocation8_spill] sm:$0xff] %v5651_v0  ;;  %v5653_v52 = vpop.f32.mrf.mxu1 }
 0x1ce   : > { %6050 = vst [vmem:[#allocation3_spill] sm:$0xff] %v5653_v52  ;;  %v5655_v1 = vpop.f32.mrf.mxu0 }
 0x1cf   : > { %6051 = vst [vmem:[#allocation4_spill] sm:$0xff] %v5655_v1  ;;  %v5657_v49 = vpop.f32.mrf.mxu1 }
 0x1d0   : > { %6052 = vst [vmem:[#allocation6_spill] sm:$0xff] %v5657_v49  ;;  %v5659_v13 = vpop.f32.mrf.mxu0 }
 0x1d1   : > { %6053 = vst [vmem:[#allocation26_spill] sm:$0xff] %v5659_v13  ;;  %v5661_v18 = vpop.f32.mrf.mxu1 }
 0x1d2   : > { %6054 = vst [vmem:[#allocation27_spill] sm:$0xff] %v5661_v18  ;;  %v5663_v53 = vpop.f32.mrf.mxu0 }
 0x1d3   : > { %6055 = vst [vmem:[#allocation28_spill] sm:$0xff] %v5663_v53  ;;  %v5665_v27 = vpop.f32.mrf.mxu1 }
 0x1d4   : > { %6056 = vst [vmem:[#allocation29_spill] sm:$0xff] %v5665_v27  ;;  %v5667_v21 = vpop.f32.mrf.mxu0 }
 0x1d5   : > { %6057 = vst [vmem:[#allocation30_spill] sm:$0xff] %v5667_v21  ;;  %v5669_v48 = vpop.f32.mrf.mxu1 }
 0x1d6   : > { %6058 = vst [vmem:[#allocation31_spill] sm:$0xff] %v5669_v48  ;;  %v5671_v12 = vpop.f32.mrf.mxu0 }
 0x1d7   : > { %6059 = vst [vmem:[#allocation32_spill] sm:$0xff] %v5671_v12  ;;  %v5673_v0 = vpop.f32.mrf.mxu1  ;;  %v2406_v12 = vadd.f32 %v4103_v43, %v5480_v29  ;;  %v2405_v29 = vadd.f32 %v5585_v2, %v5489_v4 }
 0x1d8   : > { %6060 = vst [vmem:[#allocation33_spill] sm:$0xff] %v5673_v0  ;;  %v5675_v52 = vpop.f32.mrf.mxu0 }
 0x1d9   : > { %6061 = vst [vmem:[#allocation34_spill] sm:$0xff] %v5675_v52  ;;  %v5677_v1 = vpop.f32.mrf.mxu1  ;;  %v2404_v52 = vadd.f32 %v2277_v50, %v5483_v15  ;;  %v5707_v15 = vld [vmem:[%s5909_s3] ss:$0 sm:$0xff] }
 0x1da   : > { %6062 = vst [vmem:[#allocation35_spill] sm:$0xff] %v5677_v1  ;;  %v5679_v49 = vpop.f32.mrf.mxu0 }
 0x1db   : > { %6063 = vst [vmem:[#allocation36_spill] sm:$0xff] %v5679_v49  ;;  %v5681_v13 = vpop.f32.mrf.mxu1 }
 0x1dc   : > { %6064 = vst [vmem:[#allocation37_spill] sm:$0xff] %v5681_v13  ;;  %v5683_v18 = vpop.f32.mrf.mxu0  ;;  %v2612_v13 = vadd.f32 %v5570_v56, %v2406_v12 }
 0x1dd   : > { %6065 = vst [vmem:[#allocation38_spill] sm:$0xff] %v5683_v18  ;;  %v5685_v53 = vpop.f32.mrf.mxu1  ;;  %v2407_v18 = vadd.f32 %v4104_v54, %v5486_v58 }
 0x1de   : > { %6066 = vst [vmem:[#allocation39_spill] sm:$0xff] %v5685_v53  ;;  %v5687_v27 = vpop.f32.mrf.mxu0 }
 0x1df   : > { %6067 = vst [vmem:[#allocation40_spill] sm:$0xff] %v5687_v27  ;;  %v5689_v21 = vpop.f32.mrf.mxu1  ;;  %v2613_v12 = vadd.f32 %v5579_v24, %v2407_v18 }
 0x1e0   : > { %6068 = vst [vmem:[#allocation41_spill] sm:$0xff] %v5689_v21  ;;  %v5692_v48 = vpop.f32.mrf.mxu0  ;;  %v2610_v21 = vadd.f32 %v5575_v51, %v2404_v52  ;;  %v2408_v52 = vadd.f32 %v5593_v30, %v5495_v5  ;;  %v2409_v30 = vadd.f32 %v5601_v10, %v5501_v8  ;;  %v2414_v8 = vadd.f32 %v5605_v34, %v5504_v11 }
 0x1e1   : > { %6069 = vst [vmem:[#allocation42_spill] sm:$0xff] %v5692_v48  ;;  %v5694_v0 = vpop.f32.mrf.mxu1 }
 0x1e2   : > { %6070 = vst [vmem:[#allocation43_spill] sm:$0xff] %v5694_v0  ;;  %v4205_v1 = vpop.f32.mrf.mxu0 }
 0x1e3   : > { %v5697_v49 = vpop.f32.mrf.mxu1 }
 0x1e4   : > { %6071 = vst [vmem:[#allocation44_spill] sm:$0xff] %v5697_v49  ;;  %v2923_v53 = vpop.f32.mrf.mxu0  ;;  %v2410_v49 = vadd.f32 %v5589_v32, %v5492_v41 }
 0x1e5   : > { %v4171_v27 = vpop.f32.mrf.mxu1 }
 0x1e6   : > { %v2840_v43 = vadd.f32 %v4171_v27, %v2612_v13  ;;  %v4206_v48 = vpop.f32.mrf.mxu0  ;;  %v2611_v27 = vadd.f32 %v5581_v59, %v2405_v29  ;;  %v2616_v5 = vadd.f32 %v5583_v26, %v2410_v49  ;;  %v2614_v59 = vadd.f32 %v5587_v20, %v2408_v52 }
 0x1e7   : > { %v2711_v50 = vpop.f32.mrf.mxu1 }
 0x1e8   : > { %v3052_v56 = vadd.f32 %v4205_v1, %v2840_v43  ;;  %v2838_v58 = vadd.f32 %v2711_v50, %v2610_v21  ;;  %v2926_v54 = vpop.f32.mrf.mxu0  ;;  %v2411_v1 = vadd.f32 %v5597_v46, %v5498_v45 }
 0x1e9   : > { %v4172_v4 = vpop.f32.mrf.mxu1 }
 0x1ea   : > { %v3091_v13 = vadd.f32 %v5707_v15, %v3052_v56  ;;  %v3050_v51 = vadd.f32 %v2923_v53, %v2838_v58  ;;  %v2841_v2 = vadd.f32 %v4172_v4, %v2613_v12  ;;  %v4209_v0 = vpop.f32.mrf.mxu0  ;;  %v2617_v26 = vadd.f32 %v5591_v47, %v2411_v1 }
 0x1eb   : > { %v2714_v21 = vpop.f32.mrf.mxu1  ;;  %v2615_v4 = vadd.f32 %v5595_v55, %v2409_v30  ;;  %v2412_v1 = vadd.f32 %v5609_v3, %v5507_v60 }
 0x1ec   : > { %v3123_v18 = vmax.f32 %v3091_v13, 0.0  ;;  %v3089_v24 = vadd.f32 %v5707_v15, %v3050_v51  ;;  %v3053_v41 = vadd.f32 %v4206_v48, %v2841_v2  ;;  %v2839_v32 = vadd.f32 %v2714_v21, %v2611_v27  ;;  %v2939_v43 = vpop.f32.mrf.mxu0 }
 0x1ed   : > { %v4175_v45 = vpop.f32.mrf.mxu1  ;;  %v2620_v2 = vadd.f32 %v5599_v62, %v2414_v8  ;;  %v2415_v21 = vadd.f32 %v5613_v57, %v5510_v33  ;;  %v2413_v62 = vadd.f32 %v5617_v39, %v5513_v17 }
 0x1ee   : > { %v3746_v53 = vpack.c.bf16 %v3123_v18, %v3123_v18  ;;  %v3121_v46 = vmax.f32 %v3089_v24, 0.0  ;;  %v3092_v48 = vadd.f32 %v5707_v15, %v3053_v41  ;;  %v3051_v29 = vadd.f32 %v2926_v54, %v2839_v32  ;;  %v4210_v49 = vpop.f32.mrf.mxu0 }
 0x1ef   : > { %v2844_v20 = vadd.f32 %v4175_v45, %v2616_v5  ;;  %v2727_v10 = vpop.f32.mrf.mxu1  ;;  %v2618_v45 = vadd.f32 %v5603_v38, %v2412_v1 }
 0x1f0   : > { %3284 = vst.msk [vmem:[%s5727_s27 + $0x8] sm:$0xf] %vm3281_vm8, %v3746_v53  ;;  %v3744_v50 = vpack.c.bf16 %v3121_v46, %v3121_v46  ;;  %v3124_v12 = vmax.f32 %v3092_v48, 0.0  ;;  %v3090_v56 = vadd.f32 %v5707_v15, %v3051_v29  ;;  %v2842_v58 = vadd.f32 %v2727_v10, %v2614_v59  ;;  %v2942_v52 = vpop.f32.mrf.mxu0 }
 0x1f1   : > { %v3056_v54 = vadd.f32 %v4209_v0, %v2844_v20  ;;  %v4176_v27 = vpop.f32.mrf.mxu1  ;;  %v2621_v53 = vadd.f32 %v5607_v44, %v2415_v21  ;;  %v2418_v46 = vadd.f32 %v5621_v36, %v5516_v19  ;;  %v2619_v20 = vadd.f32 %v5611_v35, %v2413_v62 }
 0x1f2   : > { %3282 = vst.msk [vmem:[%s5727_s27] sm:$0xf] %vm3281_vm8, %v3744_v50  ;;  %v3747_v47 = vpack.c.bf16 %v3124_v12, %v3124_v12  ;;  %v3122_v13 = vmax.f32 %v3090_v56, 0.0  ;;  %v3054_v11 = vadd.f32 %v2939_v43, %v2842_v58  ;;  %v2845_v34 = vadd.f32 %v4176_v27, %v2617_v26  ;;  %v4213_v51 = vpop.f32.mrf.mxu0 }
 0x1f3   : > { %v3095_v55 = vadd.f32 %v5707_v15, %v3056_v54  ;;  %v2730_v0 = vpop.f32.mrf.mxu1  ;;  %v2416_v10 = vadd.f32 %v5625_v31, %v5519_v25  ;;  %v2624_v58 = vadd.f32 %v5615_v9, %v2418_v46 }
 0x1f4   : > { %3285 = vst.msk [vmem:[%s5727_s27 + $0xc] sm:$0xf] %vm3281_vm8, %v3747_v47  ;;  %v3745_v18 = vpack.c.bf16 %v3122_v13, %v3122_v13  ;;  %v3093_v24 = vadd.f32 %v5707_v15, %v3054_v11  ;;  %v3057_v41 = vadd.f32 %v4210_v49, %v2845_v34  ;;  %v2843_v32 = vadd.f32 %v2730_v0, %v2615_v4  ;;  %v2955_v43 = vpop.f32.mrf.mxu0 }
 0x1f5   : > { %v3127_v5 = vmax.f32 %v3095_v55, 0.0  ;;  %v4179_v59 = vpop.f32.mrf.mxu1  ;;  %v2622_v47 = vadd.f32 %v5619_v16, %v2416_v10  ;;  %v2419_v13 = vadd.f32 %v5629_v7, %v5522_v37  ;;  %v2417_v11 = vadd.f32 %v5633_v61, %v5525_v28 }
 0x1f6   : > { %3283 = vst.msk [vmem:[%s5727_s27 + $0x4] sm:$0xf] %vm3281_vm8, %v3745_v18  ;;  %v3125_v60 = vmax.f32 %v3093_v24, 0.0  ;;  %v3096_v33 = vadd.f32 %v5707_v15, %v3057_v41  ;;  %v3055_v3 = vadd.f32 %v2942_v52, %v2843_v32  ;;  %v2848_v57 = vadd.f32 %v4179_v59, %v2620_v2  ;;  %v4214_v30 = vpop.f32.mrf.mxu0 }
 0x1f7   : > { %v3750_v17 = vpack.c.bf16 %v3127_v5, %v3127_v5  ;;  %v2743_v39 = vpop.f32.mrf.mxu1  ;;  %v2422_v16 = vadd.f32 %v5637_v6, %v5528_v22  ;;  %v2625_v41 = vadd.f32 %v5623_v23, %v2419_v13  ;;  %v2623_v32 = vadd.f32 %v5627_v14, %v2417_v11  ;;  %v6081_v13 = vld [vmem:[#allocation6_spill] sm:$0xff] }
 0x1f8   : > { %v3748_v48 = vpack.c.bf16 %v3125_v60, %v3125_v60  ;;  %v3128_v29 = vmax.f32 %v3096_v33, 0.0  ;;  %v3094_v49 = vadd.f32 %v5707_v15, %v3055_v3  ;;  %v3060_v26 = vadd.f32 %v4213_v51, %v2848_v57  ;;  %v2958_v8 = vpop.f32.mrf.mxu0  ;;  %v6072_v57 = vld [vmem:[#allocation9_spill] sm:$0xff] }
 0x1f9   : > { %3288 = vst.msk [vmem:[%s5727_s27 + $0x18] sm:$0xf] %vm3281_vm8, %v3750_v17  ;;  %v2846_v38 = vadd.f32 %v2743_v39, %v2618_v45  ;;  %v4180_v44 = vpop.f32.mrf.mxu1  ;;  %v2628_v3 = vadd.f32 %v5631_v42, %v2422_v16  ;;  %v6074_v39 = vld [vmem:[#allocation2_spill] sm:$0xff]  ;;  %v6082_v16 = vld [vmem:[#allocation16_spill] sm:$0xff] }
 0x1fa   : > { %3286 = vst.msk [vmem:[%s5727_s27 + $0x10] sm:$0xf] %vm3281_vm8, %v3748_v48  ;;  %v3751_v19 = vpack.c.bf16 %v3128_v29, %v3128_v29  ;;  %v3126_v36 = vmax.f32 %v3094_v49, 0.0  ;;  %v3099_v50 = vadd.f32 %v5707_v15, %v3060_v26  ;;  %v2849_v12 = vadd.f32 %v4180_v44, %v2621_v53  ;;  %v4217_v56 = vpop.f32.mrf.mxu0 }
 0x1fb   : > { %v3058_v52 = vadd.f32 %v2955_v43, %v2846_v38  ;;  %v2746_v35 = vpop.f32.mrf.mxu1  ;;  %v2420_v43 = vadd.f32 %v5641_v40, %v5531_v63  ;;  %v6075_v38 = vld [vmem:[#allocation20_spill] sm:$0xff] }
 0x1fc   : > { %3289 = vst.msk [vmem:[%s5727_s27 + $0x1c] sm:$0xf] %vm3281_vm8, %v3751_v19  ;;  %v3749_v25 = vpack.c.bf16 %v3126_v36, %v3126_v36  ;;  %v3131_v31 = vmax.f32 %v3099_v50, 0.0  ;;  %v3061_v4 = vadd.f32 %v4214_v30, %v2849_v12  ;;  %v2847_v54 = vadd.f32 %v2746_v35, %v2619_v20  ;;  %v2971_v27 = vpop.f32.mrf.mxu0  ;;  %v6073_v30 = vld [vmem:[#allocation18_spill] sm:$0xff]  ;;  %v6076_v19 = vld [vmem:[#allocation7_spill] sm:$0xff] }
 0x1fd   : > { %v3097_v9 = vadd.f32 %v5707_v15, %v3058_v52  ;;  %v4183_v34 = vpop.f32.mrf.mxu1  ;;  %v2423_v45 = vadd.f32 %v6073_v30, %v6072_v57  ;;  %v2626_v48 = vadd.f32 %v6074_v39, %v2420_v43  ;;  %v6077_v36 = vld [vmem:[#allocation23_spill] sm:$0xff] }
 0x1fe   : > { %3287 = vst.msk [vmem:[%s5727_s27 + $0x14] sm:$0xf] %vm3281_vm8, %v3749_v25  ;;  %v3754_v51 = vpack.c.bf16 %v3131_v31, %v3131_v31  ;;  %v3100_v2 = vadd.f32 %v5707_v15, %v3061_v4  ;;  %v3059_v1 = vadd.f32 %v2958_v8, %v2847_v54  ;;  %v2852_v21 = vadd.f32 %v4183_v34, %v2624_v58  ;;  %v4218_v55 = vpop.f32.mrf.mxu0  ;;  %v6078_v12 = vld [vmem:[#allocation11_spill] sm:$0xff] }
 0x1ff   : > { %v3129_v0 = vmax.f32 %v3097_v9, 0.0  ;;  %v2759_v18 = vpop.f32.mrf.mxu1  ;;  %v2629_v44 = vadd.f32 %v6075_v38, %v2423_v45  ;;  %v2421_v50 = vadd.f32 %v6077_v36, %v6076_v19  ;;  %v6092_v38 = vld [vmem:[#allocation31_spill] sm:$0xff]  ;;  %v6093_v19 = vld [vmem:[#allocation5_spill] sm:$0xff] }
 0x200   : > { %3292 = vst.msk [vmem:[%s5727_s27 + $0x28] sm:$0xf] %vm3281_vm8, %v3754_v51  ;;  %v3132_v37 = vmax.f32 %v3100_v2, 0.0  ;;  %v3098_v28 = vadd.f32 %v5707_v15, %v3059_v1  ;;  %v3064_v61 = vadd.f32 %v4217_v56, %v2852_v21  ;;  %v2850_v7 = vadd.f32 %v2759_v18, %v2622_v47  ;;  %v2974_v24 = vpop.f32.mrf.mxu0  ;;  %v6079_v56 = vld [vmem:[#allocation3_spill] sm:$0xff]  ;;  %v6080_v47 = vld [vmem:[#allocation13_spill] sm:$0xff] }
 0x201   : > { %v3752_v22 = vpack.c.bf16 %v3129_v0, %v3129_v0  ;;  %v4184_v6 = vpop.f32.mrf.mxu1  ;;  %v2426_v58 = vadd.f32 %v6079_v56, %v6078_v12  ;;  %v2424_v11 = vadd.f32 %v6081_v13, %v6080_v47  ;;  %v2627_v0 = vadd.f32 %v6082_v16, %v2421_v50  ;;  %v6083_v18 = vld [vmem:[#allocation21_spill] sm:$0xff] }
 0x202   : > { %v3755_v62 = vpack.c.bf16 %v3132_v37, %v3132_v37  ;;  %v3130_v5 = vmax.f32 %v3098_v28, 0.0  ;;  %v3103_v59 = vadd.f32 %v5707_v15, %v3064_v61  ;;  %v3062_v60 = vadd.f32 %v2971_v27, %v2850_v7  ;;  %v4221_v33 = vpop.f32.mrf.mxu0  ;;  %v6084_v28 = vld [vmem:[#allocation15_spill] sm:$0xff]  ;;  %v6094_v36 = vld [vmem:[#allocation33_spill] sm:$0xff] }
 0x203   : > { %3290 = vst.msk [vmem:[%s5727_s27 + $0x20] sm:$0xf] %vm3281_vm8, %v3752_v22  ;;  %v2853_v23 = vadd.f32 %v4184_v6, %v2625_v41  ;;  %v2762_v14 = vpop.f32.mrf.mxu1  ;;  %v2632_v37 = vadd.f32 %v6083_v18, %v2426_v58  ;;  %v6085_v61 = vld [vmem:[#allocation27_spill] sm:$0xff]  ;;  %v2428_v50 = vadd.f32 %v6094_v36, %v6093_v19  ;;  %v6100_v18 = vld [vmem:[#allocation37_spill] sm:$0xff] }
 0x204   : > { %3293 = vst.msk [vmem:[%s5727_s27 + $0x2c] sm:$0xf] %vm3281_vm8, %v3755_v62  ;;  %v3753_v63 = vpack.c.bf16 %v3130_v5, %v3130_v5  ;;  %v3135_v40 = vmax.f32 %v3103_v59, 0.0  ;;  %v3101_v53 = vadd.f32 %v5707_v15, %v3062_v60  ;;  %v2851_v46 = vadd.f32 %v2762_v14, %v2623_v32  ;;  %v2987_v17 = vpop.f32.mrf.mxu0  ;;  %v6086_v5 = vld [vmem:[#allocation8_spill] sm:$0xff]  ;;  %v6087_v60 = vld [vmem:[#allocation19_spill] sm:$0xff] }
 0x205   : > { %v3065_v29 = vadd.f32 %v4218_v55, %v2853_v23  ;;  %v4187_v42 = vpop.f32.mrf.mxu1  ;;  %v2427_v7 = vadd.f32 %v6085_v61, %v6084_v28  ;;  %v2630_v59 = vadd.f32 %v6086_v5, %v2424_v11  ;;  %v6103_v5 = vld [vmem:[#allocation39_spill] sm:$0xff] }
 0x206   : > { %3291 = vst.msk [vmem:[%s5727_s27 + $0x24] sm:$0xf] %vm3281_vm8, %v3753_v63  ;;  %v3758_v49 = vpack.c.bf16 %v3135_v40, %v3135_v40  ;;  %v3133_v26 = vmax.f32 %v3101_v53, 0.0  ;;  %v3063_v8 = vadd.f32 %v2974_v24, %v2851_v46  ;;  %v2856_v20 = vadd.f32 %v4187_v42, %v2628_v3  ;;  %v4222_v10 = vpop.f32.mrf.mxu0  ;;  %v6089_v53 = vld [vmem:[#allocation4_spill] sm:$0xff] }
 0x207   : > { %v3104_v52 = vadd.f32 %v5707_v15, %v3065_v29  ;;  %v2775_v35 = vpop.f32.mrf.mxu1  ;;  %v2633_v46 = vadd.f32 %v6089_v53, %v2427_v7 }
 0x208   : > { %3296 = vst.msk [vmem:[%s5727_s27 + $0x38] sm:$0xf] %vm3281_vm8, %v3758_v49  ;;  %v3756_v25 = vpack.c.bf16 %v3133_v26, %v3133_v26  ;;  %v3102_v31 = vadd.f32 %v5707_v15, %v3063_v8  ;;  %v3068_v4 = vadd.f32 %v4221_v33, %v2856_v20  ;;  %v2854_v54 = vadd.f32 %v2775_v35, %v2626_v48  ;;  %v2990_v27 = vpop.f32.mrf.mxu0  ;;  %v6088_v33 = vld [vmem:[#allocation29_spill] sm:$0xff]  ;;  %v6090_v8 = vld [vmem:[#allocation26_spill] sm:$0xff] }
 0x209   : > { %v3136_v9 = vmax.f32 %v3104_v52, 0.0  ;;  %v4188_v34 = vpop.f32.mrf.mxu1  ;;  %v2425_v3 = vadd.f32 %v6088_v33, %v6087_v60 }
 0x20a   : > { %3294 = vst.msk [vmem:[%s5727_s27 + $0x30] sm:$0xf] %vm3281_vm8, %v3756_v25  ;;  %v3134_v51 = vmax.f32 %v3102_v31, 0.0  ;;  %v3107_v2 = vadd.f32 %v5707_v15, %v3068_v4  ;;  %v3066_v1 = vadd.f32 %v2987_v17, %v2854_v54  ;;  %v2857_v21 = vadd.f32 %v4188_v34, %v2629_v44  ;;  %v4225_v55 = vpop.f32.mrf.mxu0  ;;  %v6095_v4 = vld [vmem:[#allocation10_spill] sm:$0xff]  ;;  %v6096_v54 = vld [vmem:[#allocation35_spill] sm:$0xff] }
 0x20b   : > { %v3759_v24 = vpack.c.bf16 %v3136_v9, %v3136_v9  ;;  %v2778_v41 = vpop.f32.mrf.mxu1  ;;  %v2631_v20 = vadd.f32 %v6090_v8, %v2425_v3  ;;  %v6107_v8 = vld [vmem:[#allocation41_spill] sm:$0xff] }
 0x20c   : > { %v3757_v32 = vpack.c.bf16 %v3134_v51, %v3134_v51  ;;  %v3139_v43 = vmax.f32 %v3107_v2, 0.0  ;;  %v3105_v22 = vadd.f32 %v5707_v15, %v3066_v1  ;;  %v3069_v6 = vadd.f32 %v4222_v10, %v2857_v21  ;;  %v3003_v62 = vpop.f32.mrf.mxu0  ;;  %v6091_v10 = vld [vmem:[#allocation24_spill] sm:$0xff] }
 0x20d   : > { %3297 = vst.msk [vmem:[%s5727_s27 + $0x3c] sm:$0xf] %vm3281_vm8, %v3759_v24  ;;  %v2855_v57 = vadd.f32 %v2778_v41, %v2627_v0  ;;  %v4191_v30 = vpop.f32.mrf.mxu1  ;;  %v2430_v44 = vadd.f32 %v6092_v38, %v6091_v10  ;;  %v6097_v1 = vld [vmem:[#allocation28_spill] sm:$0xff]  ;;  %v6108_v10 = vld [vmem:[#allocation22_spill] sm:$0xff]  ;;  %v6109_v38 = vld [vmem:[#allocation43_spill] sm:$0xff] }
 0x20e   : > { %3295 = vst.msk [vmem:[%s5727_s27 + $0x34] sm:$0xf] %vm3281_vm8, %v3757_v32  ;;  %v3762_v45 = vpack.c.bf16 %v3139_v43, %v3139_v43  ;;  %v3137_v23 = vmax.f32 %v3105_v22, 0.0  ;;  %v3108_v14 = vadd.f32 %v5707_v15, %v3069_v6  ;;  %v2860_v63 = vadd.f32 %v4191_v30, %v2632_v37  ;;  %v4226_v40 = vpop.f32.mrf.mxu0  ;;  %v6099_v0 = vld [vmem:[#allocation12_spill] sm:$0xff] }
 0x20f   : > { %v3067_v17 = vadd.f32 %v2990_v27, %v2855_v57  ;;  %v2791_v39 = vpop.f32.mrf.mxu1  ;;  %v2431_v27 = vadd.f32 %v6096_v54, %v6095_v4  ;;  %v2636_v21 = vadd.f32 %v6097_v1, %v2430_v44  ;;  %v2429_v37 = vadd.f32 %v6100_v18, %v6099_v0  ;;  %v6101_v22 = vld [vmem:[#allocation32_spill] sm:$0xff] }
 0x210   : > { %3300 = vst.msk [vmem:[%s5727_s27 + $0x48] sm:$0xf] %vm3281_vm8, %v3762_v45  ;;  %v3760_v48 = vpack.c.bf16 %v3137_v23, %v3137_v23  ;;  %v3140_v29 = vmax.f32 %v3108_v14, 0.0  ;;  %v3072_v42 = vadd.f32 %v4225_v55, %v2860_v63  ;;  %v2858_v49 = vadd.f32 %v2791_v39, %v2630_v59  ;;  %v3006_v26 = vpop.f32.mrf.mxu0  ;;  %v6098_v55 = vld [vmem:[#allocation30_spill] sm:$0xff] }
 0x211   : > { %v3106_v12 = vadd.f32 %v5707_v15, %v3067_v17  ;;  %v4192_v56 = vpop.f32.mrf.mxu1  ;;  %v2634_v16 = vadd.f32 %v6098_v55, %v2428_v50  ;;  %v2637_v6 = vadd.f32 %v6101_v22, %v2431_v27  ;;  %v6104_v14 = vld [vmem:[#allocation34_spill] sm:$0xff]  ;;  %v2435_v44 = vadd.f32 %v6109_v38, %v6108_v10 }
 0x212   : > { %3298 = vst.msk [vmem:[%s5727_s27 + $0x40] sm:$0xf] %vm3281_vm8, %v3760_v48  ;;  %v3763_v58 = vpack.c.bf16 %v3140_v29, %v3140_v29  ;;  %v3111_v52 = vadd.f32 %v5707_v15, %v3072_v42  ;;  %v3070_v35 = vadd.f32 %v3003_v62, %v2858_v49  ;;  %v2861_v25 = vadd.f32 %v4192_v56, %v2633_v46  ;;  %v4229_v31 = vpop.f32.mrf.mxu0  ;;  %v6102_v62 = vld [vmem:[#allocation14_spill] sm:$0xff]  ;;  %v6105_v42 = vld [vmem:[#allocation36_spill] sm:$0xff] }
 0x213   : > { %v3138_v47 = vmax.f32 %v3106_v12, 0.0  ;;  %v2794_v13 = vpop.f32.mrf.mxu1  ;;  %v2434_v59 = vadd.f32 %v6103_v5, %v6102_v62  ;;  %v2635_v63 = vadd.f32 %v6104_v14, %v2429_v37  ;;  %v6114_v37 = vld [vmem:[#allocation42_spill] sm:$0xff] }
 0x214   : > { %3301 = vst.msk [vmem:[%s5727_s27 + $0x4c] sm:$0xf] %vm3281_vm8, %v3763_v58  ;;  %v3143_v11 = vmax.f32 %v3111_v52, 0.0  ;;  %v3109_v9 = vadd.f32 %v5707_v15, %v3070_v35  ;;  %v3073_v34 = vadd.f32 %v4226_v40, %v2861_v25  ;;  %v2859_v51 = vadd.f32 %v2794_v13, %v2631_v20  ;;  %v3019_v2 = vpop.f32.mrf.mxu0  ;;  %v6110_v52 = vld [vmem:[#allocation25_spill] sm:$0xff]  ;;  %v6111_v35 = vld [vmem:[#allocation44_spill] sm:$0xff] }
 0x215   : > { %v3761_v28 = vpack.c.bf16 %v3138_v47, %v3138_v47  ;;  %v4195_v61 = vpop.f32.mrf.mxu1  ;;  %v2640_v49 = vadd.f32 %v6105_v42, %v2434_v59  ;;  %v2433_v25 = vadd.f32 %v6111_v35, %v6110_v52 }
 0x216   : > { %v3766_v7 = vpack.c.bf16 %v3143_v11, %v3143_v11  ;;  %v3141_v24 = vmax.f32 %v3109_v9, 0.0  ;;  %v3112_v41 = vadd.f32 %v5707_v15, %v3073_v34  ;;  %v3071_v32 = vadd.f32 %v3006_v26, %v2859_v51  ;;  %v4230_v43 = vpop.f32.mrf.mxu0  ;;  %v6106_v26 = vld [vmem:[#allocation17_spill] sm:$0xff]  ;;  %v6112_v9 = vld [vmem:[#allocation38_spill] sm:$0xff]  ;;  %v6113_v51 = vld [vmem:[#allocation40_spill] sm:$0xff] }
 0x217   : > { %3299 = vst.msk [vmem:[%s5727_s27 + $0x44] sm:$0xf] %vm3281_vm8, %v3761_v28  ;;  %v2864_v60 = vadd.f32 %v4195_v61, %v2636_v21  ;;  %v2807_v33 = vpop.f32.mrf.mxu1  ;;  %v2432_v20 = vadd.f32 %v6107_v8, %v6106_v26  ;;  %v2639_v28 = vadd.f32 %v6114_v37, %v2433_v25 }
 0x218   : > { %3304 = vst.msk [vmem:[%s5727_s27 + $0x58] sm:$0xf] %vm3281_vm8, %v3766_v7  ;;  %v3764_v3 = vpack.c.bf16 %v3141_v24, %v3141_v24  ;;  %v3144_v57 = vmax.f32 %v3112_v41, 0.0  ;;  %v3110_v30 = vadd.f32 %v5707_v15, %v3071_v32  ;;  %v2862_v45 = vadd.f32 %v2807_v33, %v2634_v16  ;;  %v3022_v23 = vpop.f32.mrf.mxu0 }
 0x219   : > { %v3076_v40 = vadd.f32 %v4229_v31, %v2864_v60  ;;  %v4196_v53 = vpop.f32.mrf.mxu1  ;;  %v2638_v34 = vadd.f32 %v6112_v9, %v2432_v20 }
 0x21a   : > { %3302 = vst.msk [vmem:[%s5727_s27 + $0x50] sm:$0xf] %vm3281_vm8, %v3764_v3  ;;  %v3767_v46 = vpack.c.bf16 %v3144_v57, %v3144_v57  ;;  %v3142_v17 = vmax.f32 %v3110_v30, 0.0  ;;  %v3074_v39 = vadd.f32 %v3019_v2, %v2862_v45  ;;  %v2865_v48 = vadd.f32 %v4196_v53, %v2637_v6  ;;  %v4233_v29 = vpop.f32.mrf.mxu0 }
 0x21b   : > { %v3115_v19 = vadd.f32 %v5707_v15, %v3076_v40  ;;  %v2810_v36 = vpop.f32.mrf.mxu1  ;;  %v2641_v2 = vadd.f32 %v6113_v51, %v2435_v44 }
 0x21c   : > { %3305 = vst.msk [vmem:[%s5727_s27 + $0x5c] sm:$0xf] %vm3281_vm8, %v3767_v46  ;;  %v3765_v50 = vpack.c.bf16 %v3142_v17, %v3142_v17  ;;  %v3113_v12 = vadd.f32 %v5707_v15, %v3074_v39  ;;  %v3077_v56 = vadd.f32 %v4230_v43, %v2865_v48  ;;  %v2863_v58 = vadd.f32 %v2810_v36, %v2635_v63  ;;  %v3035_v54 = vpop.f32.mrf.mxu0 }
 0x21d   : > { %v3147_v31 = vmax.f32 %v3115_v19, 0.0  ;;  %v4199_v4 = vpop.f32.mrf.mxu1 }
 0x21e   : > { %3303 = vst.msk [vmem:[%s5727_s27 + $0x54] sm:$0xf] %vm3281_vm8, %v3765_v50  ;;  %v3145_v27 = vmax.f32 %v3113_v12, 0.0  ;;  %v3116_v47 = vadd.f32 %v5707_v15, %v3077_v56  ;;  %v3075_v13 = vadd.f32 %v3022_v23, %v2863_v58  ;;  %v2868_v11 = vadd.f32 %v4199_v4, %v2640_v49  ;;  %v4234_v24 = vpop.f32.mrf.mxu0 }
 0x21f   : > { %v3770_v1 = vpack.c.bf16 %v3147_v31, %v3147_v31  ;;  %v2823_v21 = vpop.f32.mrf.mxu1 }
 0x220   : > { %v3768_v55 = vpack.c.bf16 %v3145_v27, %v3145_v27  ;;  %v3148_v16 = vmax.f32 %v3116_v47, 0.0  ;;  %v3114_v0 = vadd.f32 %v5707_v15, %v3075_v13  ;;  %v3080_v18 = vadd.f32 %v4233_v29, %v2868_v11  ;;  %v3038_v57 = vpop.f32.mrf.mxu0 }
 0x221   : > { %3308 = vst.msk [vmem:[%s5727_s27 + $0x68] sm:$0xf] %vm3281_vm8, %v3770_v1  ;;  %v2866_v61 = vadd.f32 %v2823_v21, %v2638_v34  ;;  %v4200_v7 = vpop.f32.mrf.mxu1 }
 0x222   : > { %3306 = vst.msk [vmem:[%s5727_s27 + $0x60] sm:$0xf] %vm3281_vm8, %v3768_v55  ;;  %v3771_v41 = vpack.c.bf16 %v3148_v16, %v3148_v16  ;;  %v3146_v32 = vmax.f32 %v3114_v0, 0.0  ;;  %v3119_v43 = vadd.f32 %v5707_v15, %v3080_v18  ;;  %v2869_v22 = vadd.f32 %v4200_v7, %v2641_v2 }
 0x223   : > { %v3078_v6 = vadd.f32 %v3035_v54, %v2866_v61  ;;  %v2826_v62 = vpop.f32.mrf.mxu1 }
 0x224   : > { %3309 = vst.msk [vmem:[%s5727_s27 + $0x6c] sm:$0xf] %vm3281_vm8, %v3771_v41  ;;  %v3769_v5 = vpack.c.bf16 %v3146_v32, %v3146_v32  ;;  %v3151_v59 = vmax.f32 %v3119_v43, 0.0  ;;  %v3081_v60 = vadd.f32 %v4234_v24, %v2869_v22  ;;  %v2867_v33 = vadd.f32 %v2826_v62, %v2639_v28 }
 0x225   : > { %v3117_v3 = vadd.f32 %v5707_v15, %v3078_v6 }
 0x226   : > { %3307 = vst.msk [vmem:[%s5727_s27 + $0x64] sm:$0xf] %vm3281_vm8, %v3769_v5  ;;  %v3774_v30 = vpack.c.bf16 %v3151_v59, %v3151_v59  ;;  %v3120_v45 = vadd.f32 %v5707_v15, %v3081_v60  ;;  %v3079_v23 = vadd.f32 %v3038_v57, %v2867_v33 }
 0x227   : > { %v3149_v14 = vmax.f32 %v3117_v3, 0.0 }
 0x228   : > { %3312 = vst.msk [vmem:[%s5727_s27 + $0x78] sm:$0xf] %vm3281_vm8, %v3774_v30  ;;  %v3152_v63 = vmax.f32 %v3120_v45, 0.0  ;;  %v3118_v40 = vadd.f32 %v5707_v15, %v3079_v23 }
 0x229   : > { %v3772_v53 = vpack.c.bf16 %v3149_v14, %v3149_v14 }
 0x22a   : > { %v3775_v46 = vpack.c.bf16 %v3152_v63, %v3152_v63  ;;  %v3150_v17 = vmax.f32 %v3118_v40, 0.0 }
 0x22b   : > { %3310 = vst.msk [vmem:[%s5727_s27 + $0x70] sm:$0xf] %vm3281_vm8, %v3772_v53 }
 0x22c   : > { %3313 = vst.msk [vmem:[%s5727_s27 + $0x7c] sm:$0xf] %vm3281_vm8, %v3775_v46  ;;  %v3773_v39 = vpack.c.bf16 %v3150_v17, %v3150_v17 }
 0x22e   : > { %3311 = vst.msk [vmem:[%s5727_s27 + $0x74] sm:$0xf] %vm3281_vm8, %v3773_v39 }
 0x22f PF: > { %s14_s17 = sadd.s32 1, %s4314_s17   ;;  %s6115_s15 = smov %s4310_s16 }
 0x230   : > { %p11_p5 = scmp.ge.s32.totalorder %s14_s17, 4   ;;  %s6116_s16 = smov %s6118_s18 }
 0x232   :  { %13 = sbr.rel (!%p11_p5) target bundleno = 2 (0x2), region = 83 }

</bundles_post_ra>
